<compile_context>
chip_gen: v7x
topology: tpu7x:2x2x1
jax: 0.10.0
libtpu: 0.0.40
codegen_flags: <defaults>
</compile_context>

<pallas_src>
import jax
import jax.numpy as jnp
from jax import lax
from jax.experimental import pallas as pl
from jax.experimental.pallas import tpu as pltpu

NEG_SLOPE = 0.01              # PyTorch nn.LeakyReLU default
REL_NAMES = ("buy", "cart", "pv")


def _leaky(x):
    return jnp.where(x > 0, x, NEG_SLOPE * x)


def _ceil8(x):
    return -(-x // 8) * 8


def _pad_rows(x, n):
    return jnp.pad(x, ((0, n - x.shape[0]), (0, 0)))


def _vmem_limit_bytes():
    # Size the scoped-VMEM limit per generation (v7x has 64 MiB total).
    try:
        cap = int(pltpu.get_tpu_info().vmem_capacity_bytes)
        return max(16 * 1024 * 1024, min(cap // 2, 64 * 1024 * 1024))
    except Exception:
        return 32 * 1024 * 1024


# ----------------------------------------------------------------------------
# Fused per-layer kernel: 3 relations x 2 GraphConv directions + 3 edge updates.
# All message passing is one-hot MXU matmuls; no scalar loops anywhere.
# ----------------------------------------------------------------------------
def make_layer_kernel(w_rel, nu, ni, e_sizes):
    w_buy, w_cart, w_pv = w_rel
    e1, e2, e3 = e_sizes
    f32 = jnp.float32

    def relation(u_r, u_c, v_r, v_c, e_ref, nu_ref, ni_ref, inv_ref,
                 src_ref, dst_ref):
        E = e_ref.shape[0]
        ew = e_ref[...]                                       # (E, d)

        # One-hot scatter (node x edge) and gather (edge x node) matrices,
        # built from index vectors with broadcasted iota comparisons.
        u_sc = (lax.broadcasted_iota(jnp.int32, (nu, E), 0) == u_r[...]).astype(f32)
        u_ga = (lax.broadcasted_iota(jnp.int32, (E, nu), 1) == u_c[...]).astype(f32)
        v_sc = (lax.broadcasted_iota(jnp.int32, (ni, E), 0) == v_r[...]).astype(f32)
        v_ga = (lax.broadcasted_iota(jnp.int32, (E, ni), 1) == v_c[...]).astype(f32)

        # Left normalization (norm='both').
        fs = src_ref[...] * nu_ref[...]       # user feats * out_deg^-1/2
        fd = dst_ref[...] * ni_ref[...]       # item feats * in_deg^-1/2

        # user -> item conv: gather src rows, u_mul_e, scatter-add (all MXU).
        msg_fwd = jnp.dot(u_ga, fs, preferred_element_type=f32) * ew
        agg_i = jnp.dot(v_sc, msg_fwd, preferred_element_type=f32)
        # item -> user conv (reverse graph, same edge ids / edge weights).
        msg_rev = jnp.dot(v_ga, fd, preferred_element_type=f32) * ew
        agg_u = jnp.dot(u_sc, msg_rev, preferred_element_type=f32)

        # update_edge(): segment sums of edge feats by u and by v, then
        # per-edge mix (src_sum[u_e] + dst_sum[v_e]) / (deg_u[u_e] + deg_v[v_e]).
        sum_u = jnp.dot(u_sc, ew, preferred_element_type=f32)   # (nu, d)
        sum_v = jnp.dot(v_sc, ew, preferred_element_type=f32)   # (ni, d)
        temp = (jnp.dot(u_ga, sum_u, preferred_element_type=f32)
                + jnp.dot(v_ga, sum_v, preferred_element_type=f32)) * inv_ref[...]
        return agg_i, agg_u, temp

    def layer_kernel(
        # VMEM int32 index vectors: (1,E) row-layout and (E,1) col-layout per rel
        ub_r, ub_c, vb_r, vb_c,
        uc_r, uc_c, vc_r, vc_c,
        up_r, up_c, vp_r, vp_c,
        # VMEM f32 inputs
        src_ref, dst_ref,
        eb_ref, ec_ref, ep_ref,
        wn_ref, we_ref,
        nub_ref, nib_ref, nuc_ref, nic_ref, nup_ref, nip_ref,
        idb_ref, idc_ref, idp_ref,
        # outputs
        new_src_ref, new_dst_ref, neb_ref, nec_ref, nep_ref,
        # VMEM scratch (stacking buffers for the fused matmuls)
        nstack, estack,
    ):
        ai_b, au_b, t_b = relation(ub_r, ub_c, vb_r, vb_c, eb_ref,
                                   nub_ref, nib_ref, idb_ref, src_ref, dst_ref)
        ai_c, au_c, t_c = relation(uc_r, uc_c, vc_r, vc_c, ec_ref,
                                   nuc_ref, nic_ref, idc_ref, src_ref, dst_ref)
        ai_p, au_p, t_p = relation(up_r, up_c, vp_r, vp_c, ep_ref,
                                   nup_ref, nip_ref, idp_ref, src_ref, dst_ref)

        # Single stacked (aggregate @ Wn) for all 3 relations x 2 directions.
        nstack[0:ni, :] = ai_b
        nstack[ni:2 * ni, :] = ai_c
        nstack[2 * ni:3 * ni, :] = ai_p
        o = 3 * ni
        nstack[o:o + nu, :] = au_b
        nstack[o + nu:o + 2 * nu, :] = au_c
        nstack[o + 2 * nu:o + 3 * nu, :] = au_p
        big = jnp.dot(nstack[...], wn_ref[...], preferred_element_type=f32)

        # Right normalization + LeakyReLU + MTL weighting; single write per output.
        new_dst_ref[...] = (w_buy * _leaky(big[0:ni] * nib_ref[...])
                            + w_cart * _leaky(big[ni:2 * ni] * nic_ref[...])
                            + w_pv * _leaky(big[2 * ni:3 * ni] * nip_ref[...]))
        new_src_ref[...] = (w_buy * _leaky(big[o:o + nu] * nub_ref[...])
                            + w_cart * _leaky(big[o + nu:o + 2 * nu] * nuc_ref[...])
                            + w_pv * _leaky(big[o + 2 * nu:o + 3 * nu] * nup_ref[...]))

        # Single stacked (edge_temp @ We) for all 3 relations.
        estack[0:e1, :] = t_b
        estack[e1:e1 + e2, :] = t_c
        estack[e1 + e2:e1 + e2 + e3, :] = t_p
        bige = _leaky(jnp.dot(estack[...], we_ref[...], preferred_element_type=f32))
        neb_ref[...] = bige[0:e1]
        nec_ref[...] = bige[e1:e1 + e2]
        nep_ref[...] = bige[e1 + e2:e1 + e2 + e3]

    return layer_kernel


# ----------------------------------------------------------------------------
# One fused pallas_call per GCN layer.
# ----------------------------------------------------------------------------
def gcn_layer(src_feat, dst_feat, edges, rels, Wn, We, mtl_w):
    nu, d = src_feat.shape
    ni = dst_feat.shape[0]
    e_sizes = tuple(edges[k].shape[0] for k in REL_NAMES)

    kernel = make_layer_kernel(tuple(float(mtl_w[k]) for k in REL_NAMES),
                               nu, ni, e_sizes)

    idx_args = []
    for k in REL_NAMES:
        r = rels[k]
        idx_args += [r["u_row"], r["u_col"], r["v_row"], r["v_col"]]
    feat_args = [src_feat, dst_feat] + [edges[k] for k in REL_NAMES] + [Wn, We]
    norm_args = []
    for k in REL_NAMES:
        norm_args += [rels[k]["norm_u"], rels[k]["norm_i"]]
    inv_args = [rels[k]["inv_degsum"] for k in REL_NAMES]
    args = idx_args + feat_args + norm_args + inv_args

    out_shape = (
        jax.ShapeDtypeStruct((nu, d), jnp.float32),
        jax.ShapeDtypeStruct((ni, d), jnp.float32),
        jax.ShapeDtypeStruct((e_sizes[0], d), jnp.float32),
        jax.ShapeDtypeStruct((e_sizes[1], d), jnp.float32),
        jax.ShapeDtypeStruct((e_sizes[2], d), jnp.float32),
    )

    vmem_spec = pl.BlockSpec(memory_space=pltpu.MemorySpace.VMEM)
    outs = pl.pallas_call(
        kernel,
        out_shape=out_shape,
        in_specs=[vmem_spec] * len(args),
        out_specs=tuple([vmem_spec] * 5),
        scratch_shapes=[
            pltpu.VMEM((3 * ni + 3 * nu, d), jnp.float32),   # node stacking buf
            pltpu.VMEM((sum(e_sizes), d), jnp.float32),      # edge stacking buf
        ],
        compiler_params=pltpu.CompilerParams(vmem_limit_bytes=_vmem_limit_bytes()),
    )(*args)

    new_src, new_dst, ne_b, ne_c, ne_p = outs
    return new_src, new_dst, {"buy": ne_b, "cart": ne_c, "pv": ne_p}


# ----------------------------------------------------------------------------
# Graph glue (plain JAX): per-relation indices (row+col layouts), norms,
# inverse degree sums, padded to multiples of 8 rows / edges.
# Padded edges point at node 0 with zero edge weight and inv_degsum 0, so they
# contribute exactly nothing.
# ----------------------------------------------------------------------------
def make_relation(u, v, num_user, num_item, nu_pad, ni_pad, e_pad):
    u = jnp.asarray(u, jnp.int32)
    v = jnp.asarray(v, jnp.int32)
    E = u.shape[0]
    # DGL GraphConv / update_edge both clamp degrees to min 1.
    out_deg = jnp.maximum(jnp.zeros((num_user,), jnp.float32).at[u].add(1.0), 1.0)
    in_deg = jnp.maximum(jnp.zeros((num_item,), jnp.float32).at[v].add(1.0), 1.0)
    norm_u = jnp.pad(out_deg ** -0.5, (0, nu_pad - num_user), constant_values=1.0)[:, None]
    norm_i = jnp.pad(in_deg ** -0.5, (0, ni_pad - num_item), constant_values=1.0)[:, None]
    inv = jnp.pad(1.0 / (out_deg[u] + in_deg[v]), (0, e_pad - E))[:, None]
    up = jnp.pad(u, (0, e_pad - E))
    vp = jnp.pad(v, (0, e_pad - E))
    return dict(u_row=up[None, :], u_col=up[:, None],
                v_row=vp[None, :], v_col=vp[:, None],
                norm_u=norm_u, norm_i=norm_i, inv_degsum=inv)


# ----------------------------------------------------------------------------
# GCN forward: l fused pallas_calls (1 per layer).
# ----------------------------------------------------------------------------
def gcn_forward(params, edges_uv, num_user, num_item, l, mtl_w):
    a = 0.0045
    b = 0.0045
    nu_pad = _ceil8(num_user)
    ni_pad = _ceil8(num_item)
    e_pad = {k: _ceil8(edges_uv[k][0].shape[0]) for k in REL_NAMES}

    rels = {k: make_relation(edges_uv[k][0], edges_uv[k][1],
                             num_user, num_item, nu_pad, ni_pad, e_pad[k])
            for k in REL_NAMES}

    src_feature = _pad_rows(params["user_emb"] * a, nu_pad)
    dst_feature = _pad_rows(params["item_emb"] * a, ni_pad)
    edges = {k: _pad_rows(params[f"{k}_edges_emb"] * b, e_pad[k]) for k in REL_NAMES}

    src_all = src_feature
    dst_all = dst_feature
    for i in range(l):
        src_feature, dst_feature, edges = gcn_layer(
            src_feature, dst_feature, edges, rels,
            params["node_weights"][i], params["edge_weights"][i], mtl_w)
        src_all = src_all + src_feature
        dst_all = dst_all + dst_feature

    return (src_all[:num_user] / (l + 1), dst_all[:num_item] / (l + 1))


# ----------------------------------------------------------------------------
# Deterministic setup + run
# ----------------------------------------------------------------------------
if __name__ == "__main__":
    num_user, num_item, emb_dim, l = 8, 16, 32, 2
    n_buy, n_cart, n_pv = 16, 12, 20
    mtl_w = {"buy": 0.5, "cart": 0.3, "pv": 0.2}

    key = jax.random.PRNGKey(0)
    keys = jax.random.split(key, 12)

    params = {
        # nn.Embedding default init ~ N(0, 1)
        "user_emb": jax.random.normal(keys[0], (num_user, emb_dim), jnp.float32),
        "item_emb": jax.random.normal(keys[1], (num_item, emb_dim), jnp.float32),
        "buy_edges_emb": jax.random.normal(keys[2], (n_buy, emb_dim), jnp.float32),
        "cart_edges_emb": jax.random.normal(keys[3], (n_cart, emb_dim), jnp.float32),
        "pv_edges_emb": jax.random.normal(keys[4], (n_pv, emb_dim), jnp.float32),
        # torch.rand ~ U[0, 1)
        "node_weights": [jax.random.uniform(jax.random.fold_in(keys[5], i),
                                            (emb_dim, emb_dim), jnp.float32)
                         for i in range(l)],
        "edge_weights": [jax.random.uniform(jax.random.fold_in(keys[6], i),
                                            (emb_dim, emb_dim), jnp.float32)
                         for i in range(l)],
        # prediction vectors exist in the module but are unused in forward()
        "buy_prediction": jax.random.uniform(keys[7], (emb_dim,), jnp.float32),
        "cart_prediction": jax.random.uniform(keys[8], (emb_dim,), jnp.float32),
        "pv_prediction": jax.random.uniform(keys[9], (emb_dim,), jnp.float32),
    }

    # Synthetic bipartite heterograph (user -> item) edge lists per behavior.
    gk = jax.random.split(keys[10], 6)
    edges_uv = {
        "buy": (jax.random.randint(gk[0], (n_buy,), 0, num_user),
                jax.random.randint(gk[1], (n_buy,), 0, num_item)),
        "cart": (jax.random.randint(gk[2], (n_cart,), 0, num_user),
                 jax.random.randint(gk[3], (n_cart,), 0, num_item)),
        "pv": (jax.random.randint(gk[4], (n_pv,), 0, num_user),
               jax.random.randint(gk[5], (n_pv,), 0, num_item)),
    }

    src_out, dst_out = gcn_forward(params, edges_uv, num_user, num_item, l, mtl_w)
    src_out = jax.block_until_ready(src_out)
    dst_out = jax.block_until_ready(dst_out)

    assert src_out.shape == (num_user, emb_dim)
    assert dst_out.shape == (num_item, emb_dim)
    assert bool(jnp.all(jnp.isfinite(src_out))) and bool(jnp.all(jnp.isfinite(dst_out)))
    print("KERNEL_OK")
</pallas_src>

<mosaic_0001>
module attributes {stable_mosaic.version = 11 : i64} {
  func.func @layer_kernel(%arg0: memref<1x16xi32, #tpu.memory_space<vmem>>, %arg1: memref<16x1xi32, #tpu.memory_space<vmem>>, %arg2: memref<1x16xi32, #tpu.memory_space<vmem>>, %arg3: memref<16x1xi32, #tpu.memory_space<vmem>>, %arg4: memref<1x16xi32, #tpu.memory_space<vmem>>, %arg5: memref<16x1xi32, #tpu.memory_space<vmem>>, %arg6: memref<1x16xi32, #tpu.memory_space<vmem>>, %arg7: memref<16x1xi32, #tpu.memory_space<vmem>>, %arg8: memref<1x24xi32, #tpu.memory_space<vmem>>, %arg9: memref<24x1xi32, #tpu.memory_space<vmem>>, %arg10: memref<1x24xi32, #tpu.memory_space<vmem>>, %arg11: memref<24x1xi32, #tpu.memory_space<vmem>>, %arg12: memref<8x32xf32, #tpu.memory_space<vmem>>, %arg13: memref<16x32xf32, #tpu.memory_space<vmem>>, %arg14: memref<16x32xf32, #tpu.memory_space<vmem>>, %arg15: memref<16x32xf32, #tpu.memory_space<vmem>>, %arg16: memref<24x32xf32, #tpu.memory_space<vmem>>, %arg17: memref<32x32xf32, #tpu.memory_space<vmem>>, %arg18: memref<32x32xf32, #tpu.memory_space<vmem>>, %arg19: memref<8x1xf32, #tpu.memory_space<vmem>>, %arg20: memref<16x1xf32, #tpu.memory_space<vmem>>, %arg21: memref<8x1xf32, #tpu.memory_space<vmem>>, %arg22: memref<16x1xf32, #tpu.memory_space<vmem>>, %arg23: memref<8x1xf32, #tpu.memory_space<vmem>>, %arg24: memref<16x1xf32, #tpu.memory_space<vmem>>, %arg25: memref<16x1xf32, #tpu.memory_space<vmem>>, %arg26: memref<16x1xf32, #tpu.memory_space<vmem>>, %arg27: memref<24x1xf32, #tpu.memory_space<vmem>>, %arg28: memref<8x32xf32, #tpu.memory_space<vmem>>, %arg29: memref<16x32xf32, #tpu.memory_space<vmem>>, %arg30: memref<16x32xf32, #tpu.memory_space<vmem>>, %arg31: memref<16x32xf32, #tpu.memory_space<vmem>>, %arg32: memref<24x32xf32, #tpu.memory_space<vmem>>, %arg33: memref<72x32xf32, #tpu.memory_space<vmem>>, %arg34: memref<56x32xf32, #tpu.memory_space<vmem>>) attributes {dimension_semantics = [], scalar_prefetch = 0 : i64, scratch_operands = 2 : i64, tpu.core_type = #tpu.core_type<tc>} {
    %c0 = arith.constant 0 : index
    %c0_0 = arith.constant 0 : index
    %0 = vector.load %arg14[%c0, %c0_0] : memref<16x32xf32, #tpu.memory_space<vmem>>, vector<16x32xf32>
    %1 = tpu.iota {dimensions = array<i32: 0>} : vector<8x16xi32>
    %c0_1 = arith.constant 0 : index
    %c0_2 = arith.constant 0 : index
    %2 = vector.load %arg0[%c0_1, %c0_2] : memref<1x16xi32, #tpu.memory_space<vmem>>, vector<1x16xi32>
    %3 = vector.broadcast %2 : vector<1x16xi32> to vector<8x16xi32>
    %4 = arith.cmpi eq, %1, %3 : vector<8x16xi32>
    %5 = arith.extui %4 : vector<8x16xi1> to vector<8x16xi32>
    %6 = arith.sitofp %5 : vector<8x16xi32> to vector<8x16xf32>
    %7 = tpu.iota {dimensions = array<i32: 1>} : vector<16x8xi32>
    %c0_3 = arith.constant 0 : index
    %c0_4 = arith.constant 0 : index
    %8 = vector.load %arg1[%c0_3, %c0_4] : memref<16x1xi32, #tpu.memory_space<vmem>>, vector<16x1xi32>
    %9 = vector.broadcast %8 : vector<16x1xi32> to vector<16x8xi32>
    %10 = arith.cmpi eq, %7, %9 : vector<16x8xi32>
    %11 = arith.extui %10 : vector<16x8xi1> to vector<16x8xi32>
    %12 = arith.sitofp %11 : vector<16x8xi32> to vector<16x8xf32>
    %13 = tpu.iota {dimensions = array<i32: 0>} : vector<16x16xi32>
    %c0_5 = arith.constant 0 : index
    %c0_6 = arith.constant 0 : index
    %14 = vector.load %arg2[%c0_5, %c0_6] : memref<1x16xi32, #tpu.memory_space<vmem>>, vector<1x16xi32>
    %15 = vector.broadcast %14 : vector<1x16xi32> to vector<16x16xi32>
    %16 = arith.cmpi eq, %13, %15 : vector<16x16xi32>
    %17 = arith.extui %16 : vector<16x16xi1> to vector<16x16xi32>
    %18 = arith.sitofp %17 : vector<16x16xi32> to vector<16x16xf32>
    %19 = tpu.iota {dimensions = array<i32: 1>} : vector<16x16xi32>
    %c0_7 = arith.constant 0 : index
    %c0_8 = arith.constant 0 : index
    %20 = vector.load %arg3[%c0_7, %c0_8] : memref<16x1xi32, #tpu.memory_space<vmem>>, vector<16x1xi32>
    %21 = vector.broadcast %20 : vector<16x1xi32> to vector<16x16xi32>
    %22 = arith.cmpi eq, %19, %21 : vector<16x16xi32>
    %23 = arith.extui %22 : vector<16x16xi1> to vector<16x16xi32>
    %24 = arith.sitofp %23 : vector<16x16xi32> to vector<16x16xf32>
    %c0_9 = arith.constant 0 : index
    %c0_10 = arith.constant 0 : index
    %25 = vector.load %arg12[%c0_9, %c0_10] : memref<8x32xf32, #tpu.memory_space<vmem>>, vector<8x32xf32>
    %c0_11 = arith.constant 0 : index
    %c0_12 = arith.constant 0 : index
    %26 = vector.load %arg19[%c0_11, %c0_12] : memref<8x1xf32, #tpu.memory_space<vmem>>, vector<8x1xf32>
    %27 = vector.broadcast %26 : vector<8x1xf32> to vector<8x32xf32>
    %28 = arith.mulf %25, %27 : vector<8x32xf32>
    %c0_13 = arith.constant 0 : index
    %c0_14 = arith.constant 0 : index
    %29 = vector.load %arg13[%c0_13, %c0_14] : memref<16x32xf32, #tpu.memory_space<vmem>>, vector<16x32xf32>
    %c0_15 = arith.constant 0 : index
    %c0_16 = arith.constant 0 : index
    %30 = vector.load %arg20[%c0_15, %c0_16] : memref<16x1xf32, #tpu.memory_space<vmem>>, vector<16x1xf32>
    %31 = vector.broadcast %30 : vector<16x1xf32> to vector<16x32xf32>
    %32 = arith.mulf %29, %31 : vector<16x32xf32>
    %cst = arith.constant dense<0.000000e+00> : vector<16x32xf32>
    %33 = tpu.matmul %12, %28, %cst {dimension_numbers = #tpu.dot_dimension_numbers<[1], [0], [0], [1], [0, 0, 1, 1], [], []>} : vector<16x8xf32>, vector<8x32xf32>, vector<16x32xf32> -> vector<16x32xf32>
    %34 = arith.mulf %33, %0 : vector<16x32xf32>
    %cst_17 = arith.constant dense<0.000000e+00> : vector<16x32xf32>
    %35 = tpu.matmul %18, %34, %cst_17 {dimension_numbers = #tpu.dot_dimension_numbers<[1], [0], [0], [1], [0, 0, 1, 1], [], []>} : vector<16x16xf32>, vector<16x32xf32>, vector<16x32xf32> -> vector<16x32xf32>
    %cst_18 = arith.constant dense<0.000000e+00> : vector<16x32xf32>
    %36 = tpu.matmul %24, %32, %cst_18 {dimension_numbers = #tpu.dot_dimension_numbers<[1], [0], [0], [1], [0, 0, 1, 1], [], []>} : vector<16x16xf32>, vector<16x32xf32>, vector<16x32xf32> -> vector<16x32xf32>
    %37 = arith.mulf %36, %0 : vector<16x32xf32>
    %cst_19 = arith.constant dense<0.000000e+00> : vector<8x32xf32>
    %38 = tpu.matmul %6, %37, %cst_19 {dimension_numbers = #tpu.dot_dimension_numbers<[1], [0], [0], [1], [0, 0, 1, 1], [], []>} : vector<8x16xf32>, vector<16x32xf32>, vector<8x32xf32> -> vector<8x32xf32>
    %cst_20 = arith.constant dense<0.000000e+00> : vector<8x32xf32>
    %39 = tpu.matmul %6, %0, %cst_20 {dimension_numbers = #tpu.dot_dimension_numbers<[1], [0], [0], [1], [0, 0, 1, 1], [], []>} : vector<8x16xf32>, vector<16x32xf32>, vector<8x32xf32> -> vector<8x32xf32>
    %cst_21 = arith.constant dense<0.000000e+00> : vector<16x32xf32>
    %40 = tpu.matmul %18, %0, %cst_21 {dimension_numbers = #tpu.dot_dimension_numbers<[1], [0], [0], [1], [0, 0, 1, 1], [], []>} : vector<16x16xf32>, vector<16x32xf32>, vector<16x32xf32> -> vector<16x32xf32>
    %cst_22 = arith.constant dense<0.000000e+00> : vector<16x32xf32>
    %41 = tpu.matmul %12, %39, %cst_22 {dimension_numbers = #tpu.dot_dimension_numbers<[1], [0], [0], [1], [0, 0, 1, 1], [], []>} : vector<16x8xf32>, vector<8x32xf32>, vector<16x32xf32> -> vector<16x32xf32>
    %cst_23 = arith.constant dense<0.000000e+00> : vector<16x32xf32>
    %42 = tpu.matmul %24, %40, %cst_23 {dimension_numbers = #tpu.dot_dimension_numbers<[1], [0], [0], [1], [0, 0, 1, 1], [], []>} : vector<16x16xf32>, vector<16x32xf32>, vector<16x32xf32> -> vector<16x32xf32>
    %43 = arith.addf %41, %42 : vector<16x32xf32>
    %c0_24 = arith.constant 0 : index
    %c0_25 = arith.constant 0 : index
    %44 = vector.load %arg25[%c0_24, %c0_25] : memref<16x1xf32, #tpu.memory_space<vmem>>, vector<16x1xf32>
    %45 = vector.broadcast %44 : vector<16x1xf32> to vector<16x32xf32>
    %46 = arith.mulf %43, %45 : vector<16x32xf32>
    %c0_26 = arith.constant 0 : index
    %c0_27 = arith.constant 0 : index
    %47 = vector.load %arg15[%c0_26, %c0_27] : memref<16x32xf32, #tpu.memory_space<vmem>>, vector<16x32xf32>
    %48 = tpu.iota {dimensions = array<i32: 0>} : vector<8x16xi32>
    %c0_28 = arith.constant 0 : index
    %c0_29 = arith.constant 0 : index
    %49 = vector.load %arg4[%c0_28, %c0_29] : memref<1x16xi32, #tpu.memory_space<vmem>>, vector<1x16xi32>
    %50 = vector.broadcast %49 : vector<1x16xi32> to vector<8x16xi32>
    %51 = arith.cmpi eq, %48, %50 : vector<8x16xi32>
    %52 = arith.extui %51 : vector<8x16xi1> to vector<8x16xi32>
    %53 = arith.sitofp %52 : vector<8x16xi32> to vector<8x16xf32>
    %54 = tpu.iota {dimensions = array<i32: 1>} : vector<16x8xi32>
    %c0_30 = arith.constant 0 : index
    %c0_31 = arith.constant 0 : index
    %55 = vector.load %arg5[%c0_30, %c0_31] : memref<16x1xi32, #tpu.memory_space<vmem>>, vector<16x1xi32>
    %56 = vector.broadcast %55 : vector<16x1xi32> to vector<16x8xi32>
    %57 = arith.cmpi eq, %54, %56 : vector<16x8xi32>
    %58 = arith.extui %57 : vector<16x8xi1> to vector<16x8xi32>
    %59 = arith.sitofp %58 : vector<16x8xi32> to vector<16x8xf32>
    %60 = tpu.iota {dimensions = array<i32: 0>} : vector<16x16xi32>
    %c0_32 = arith.constant 0 : index
    %c0_33 = arith.constant 0 : index
    %61 = vector.load %arg6[%c0_32, %c0_33] : memref<1x16xi32, #tpu.memory_space<vmem>>, vector<1x16xi32>
    %62 = vector.broadcast %61 : vector<1x16xi32> to vector<16x16xi32>
    %63 = arith.cmpi eq, %60, %62 : vector<16x16xi32>
    %64 = arith.extui %63 : vector<16x16xi1> to vector<16x16xi32>
    %65 = arith.sitofp %64 : vector<16x16xi32> to vector<16x16xf32>
    %66 = tpu.iota {dimensions = array<i32: 1>} : vector<16x16xi32>
    %c0_34 = arith.constant 0 : index
    %c0_35 = arith.constant 0 : index
    %67 = vector.load %arg7[%c0_34, %c0_35] : memref<16x1xi32, #tpu.memory_space<vmem>>, vector<16x1xi32>
    %68 = vector.broadcast %67 : vector<16x1xi32> to vector<16x16xi32>
    %69 = arith.cmpi eq, %66, %68 : vector<16x16xi32>
    %70 = arith.extui %69 : vector<16x16xi1> to vector<16x16xi32>
    %71 = arith.sitofp %70 : vector<16x16xi32> to vector<16x16xf32>
    %c0_36 = arith.constant 0 : index
    %c0_37 = arith.constant 0 : index
    %72 = vector.load %arg12[%c0_36, %c0_37] : memref<8x32xf32, #tpu.memory_space<vmem>>, vector<8x32xf32>
    %c0_38 = arith.constant 0 : index
    %c0_39 = arith.constant 0 : index
    %73 = vector.load %arg21[%c0_38, %c0_39] : memref<8x1xf32, #tpu.memory_space<vmem>>, vector<8x1xf32>
    %74 = vector.broadcast %73 : vector<8x1xf32> to vector<8x32xf32>
    %75 = arith.mulf %72, %74 : vector<8x32xf32>
    %c0_40 = arith.constant 0 : index
    %c0_41 = arith.constant 0 : index
    %76 = vector.load %arg13[%c0_40, %c0_41] : memref<16x32xf32, #tpu.memory_space<vmem>>, vector<16x32xf32>
    %c0_42 = arith.constant 0 : index
    %c0_43 = arith.constant 0 : index
    %77 = vector.load %arg22[%c0_42, %c0_43] : memref<16x1xf32, #tpu.memory_space<vmem>>, vector<16x1xf32>
    %78 = vector.broadcast %77 : vector<16x1xf32> to vector<16x32xf32>
    %79 = arith.mulf %76, %78 : vector<16x32xf32>
    %cst_44 = arith.constant dense<0.000000e+00> : vector<16x32xf32>
    %80 = tpu.matmul %59, %75, %cst_44 {dimension_numbers = #tpu.dot_dimension_numbers<[1], [0], [0], [1], [0, 0, 1, 1], [], []>} : vector<16x8xf32>, vector<8x32xf32>, vector<16x32xf32> -> vector<16x32xf32>
    %81 = arith.mulf %80, %47 : vector<16x32xf32>
    %cst_45 = arith.constant dense<0.000000e+00> : vector<16x32xf32>
    %82 = tpu.matmul %65, %81, %cst_45 {dimension_numbers = #tpu.dot_dimension_numbers<[1], [0], [0], [1], [0, 0, 1, 1], [], []>} : vector<16x16xf32>, vector<16x32xf32>, vector<16x32xf32> -> vector<16x32xf32>
    %cst_46 = arith.constant dense<0.000000e+00> : vector<16x32xf32>
    %83 = tpu.matmul %71, %79, %cst_46 {dimension_numbers = #tpu.dot_dimension_numbers<[1], [0], [0], [1], [0, 0, 1, 1], [], []>} : vector<16x16xf32>, vector<16x32xf32>, vector<16x32xf32> -> vector<16x32xf32>
    %84 = arith.mulf %83, %47 : vector<16x32xf32>
    %cst_47 = arith.constant dense<0.000000e+00> : vector<8x32xf32>
    %85 = tpu.matmul %53, %84, %cst_47 {dimension_numbers = #tpu.dot_dimension_numbers<[1], [0], [0], [1], [0, 0, 1, 1], [], []>} : vector<8x16xf32>, vector<16x32xf32>, vector<8x32xf32> -> vector<8x32xf32>
    %cst_48 = arith.constant dense<0.000000e+00> : vector<8x32xf32>
    %86 = tpu.matmul %53, %47, %cst_48 {dimension_numbers = #tpu.dot_dimension_numbers<[1], [0], [0], [1], [0, 0, 1, 1], [], []>} : vector<8x16xf32>, vector<16x32xf32>, vector<8x32xf32> -> vector<8x32xf32>
    %cst_49 = arith.constant dense<0.000000e+00> : vector<16x32xf32>
    %87 = tpu.matmul %65, %47, %cst_49 {dimension_numbers = #tpu.dot_dimension_numbers<[1], [0], [0], [1], [0, 0, 1, 1], [], []>} : vector<16x16xf32>, vector<16x32xf32>, vector<16x32xf32> -> vector<16x32xf32>
    %cst_50 = arith.constant dense<0.000000e+00> : vector<16x32xf32>
    %88 = tpu.matmul %59, %86, %cst_50 {dimension_numbers = #tpu.dot_dimension_numbers<[1], [0], [0], [1], [0, 0, 1, 1], [], []>} : vector<16x8xf32>, vector<8x32xf32>, vector<16x32xf32> -> vector<16x32xf32>
    %cst_51 = arith.constant dense<0.000000e+00> : vector<16x32xf32>
    %89 = tpu.matmul %71, %87, %cst_51 {dimension_numbers = #tpu.dot_dimension_numbers<[1], [0], [0], [1], [0, 0, 1, 1], [], []>} : vector<16x16xf32>, vector<16x32xf32>, vector<16x32xf32> -> vector<16x32xf32>
    %90 = arith.addf %88, %89 : vector<16x32xf32>
    %c0_52 = arith.constant 0 : index
    %c0_53 = arith.constant 0 : index
    %91 = vector.load %arg26[%c0_52, %c0_53] : memref<16x1xf32, #tpu.memory_space<vmem>>, vector<16x1xf32>
    %92 = vector.broadcast %91 : vector<16x1xf32> to vector<16x32xf32>
    %93 = arith.mulf %90, %92 : vector<16x32xf32>
    %c0_54 = arith.constant 0 : index
    %c0_55 = arith.constant 0 : index
    %94 = vector.load %arg16[%c0_54, %c0_55] : memref<24x32xf32, #tpu.memory_space<vmem>>, vector<24x32xf32>
    %95 = tpu.iota {dimensions = array<i32: 0>} : vector<8x24xi32>
    %c0_56 = arith.constant 0 : index
    %c0_57 = arith.constant 0 : index
    %96 = vector.load %arg8[%c0_56, %c0_57] : memref<1x24xi32, #tpu.memory_space<vmem>>, vector<1x24xi32>
    %97 = vector.broadcast %96 : vector<1x24xi32> to vector<8x24xi32>
    %98 = arith.cmpi eq, %95, %97 : vector<8x24xi32>
    %99 = arith.extui %98 : vector<8x24xi1> to vector<8x24xi32>
    %100 = arith.sitofp %99 : vector<8x24xi32> to vector<8x24xf32>
    %101 = tpu.iota {dimensions = array<i32: 1>} : vector<24x8xi32>
    %c0_58 = arith.constant 0 : index
    %c0_59 = arith.constant 0 : index
    %102 = vector.load %arg9[%c0_58, %c0_59] : memref<24x1xi32, #tpu.memory_space<vmem>>, vector<24x1xi32>
    %103 = vector.broadcast %102 : vector<24x1xi32> to vector<24x8xi32>
    %104 = arith.cmpi eq, %101, %103 : vector<24x8xi32>
    %105 = arith.extui %104 : vector<24x8xi1> to vector<24x8xi32>
    %106 = arith.sitofp %105 : vector<24x8xi32> to vector<24x8xf32>
    %107 = tpu.iota {dimensions = array<i32: 0>} : vector<16x24xi32>
    %c0_60 = arith.constant 0 : index
    %c0_61 = arith.constant 0 : index
    %108 = vector.load %arg10[%c0_60, %c0_61] : memref<1x24xi32, #tpu.memory_space<vmem>>, vector<1x24xi32>
    %109 = vector.broadcast %108 : vector<1x24xi32> to vector<16x24xi32>
    %110 = arith.cmpi eq, %107, %109 : vector<16x24xi32>
    %111 = arith.extui %110 : vector<16x24xi1> to vector<16x24xi32>
    %112 = arith.sitofp %111 : vector<16x24xi32> to vector<16x24xf32>
    %113 = tpu.iota {dimensions = array<i32: 1>} : vector<24x16xi32>
    %c0_62 = arith.constant 0 : index
    %c0_63 = arith.constant 0 : index
    %114 = vector.load %arg11[%c0_62, %c0_63] : memref<24x1xi32, #tpu.memory_space<vmem>>, vector<24x1xi32>
    %115 = vector.broadcast %114 : vector<24x1xi32> to vector<24x16xi32>
    %116 = arith.cmpi eq, %113, %115 : vector<24x16xi32>
    %117 = arith.extui %116 : vector<24x16xi1> to vector<24x16xi32>
    %118 = arith.sitofp %117 : vector<24x16xi32> to vector<24x16xf32>
    %c0_64 = arith.constant 0 : index
    %c0_65 = arith.constant 0 : index
    %119 = vector.load %arg12[%c0_64, %c0_65] : memref<8x32xf32, #tpu.memory_space<vmem>>, vector<8x32xf32>
    %c0_66 = arith.constant 0 : index
    %c0_67 = arith.constant 0 : index
    %120 = vector.load %arg23[%c0_66, %c0_67] : memref<8x1xf32, #tpu.memory_space<vmem>>, vector<8x1xf32>
    %121 = vector.broadcast %120 : vector<8x1xf32> to vector<8x32xf32>
    %122 = arith.mulf %119, %121 : vector<8x32xf32>
    %c0_68 = arith.constant 0 : index
    %c0_69 = arith.constant 0 : index
    %123 = vector.load %arg13[%c0_68, %c0_69] : memref<16x32xf32, #tpu.memory_space<vmem>>, vector<16x32xf32>
    %c0_70 = arith.constant 0 : index
    %c0_71 = arith.constant 0 : index
    %124 = vector.load %arg24[%c0_70, %c0_71] : memref<16x1xf32, #tpu.memory_space<vmem>>, vector<16x1xf32>
    %125 = vector.broadcast %124 : vector<16x1xf32> to vector<16x32xf32>
    %126 = arith.mulf %123, %125 : vector<16x32xf32>
    %cst_72 = arith.constant dense<0.000000e+00> : vector<24x32xf32>
    %127 = tpu.matmul %106, %122, %cst_72 {dimension_numbers = #tpu.dot_dimension_numbers<[1], [0], [0], [1], [0, 0, 1, 1], [], []>} : vector<24x8xf32>, vector<8x32xf32>, vector<24x32xf32> -> vector<24x32xf32>
    %128 = arith.mulf %127, %94 : vector<24x32xf32>
    %cst_73 = arith.constant dense<0.000000e+00> : vector<16x32xf32>
    %129 = tpu.matmul %112, %128, %cst_73 {dimension_numbers = #tpu.dot_dimension_numbers<[1], [0], [0], [1], [0, 0, 1, 1], [], []>} : vector<16x24xf32>, vector<24x32xf32>, vector<16x32xf32> -> vector<16x32xf32>
    %cst_74 = arith.constant dense<0.000000e+00> : vector<24x32xf32>
    %130 = tpu.matmul %118, %126, %cst_74 {dimension_numbers = #tpu.dot_dimension_numbers<[1], [0], [0], [1], [0, 0, 1, 1], [], []>} : vector<24x16xf32>, vector<16x32xf32>, vector<24x32xf32> -> vector<24x32xf32>
    %131 = arith.mulf %130, %94 : vector<24x32xf32>
    %cst_75 = arith.constant dense<0.000000e+00> : vector<8x32xf32>
    %132 = tpu.matmul %100, %131, %cst_75 {dimension_numbers = #tpu.dot_dimension_numbers<[1], [0], [0], [1], [0, 0, 1, 1], [], []>} : vector<8x24xf32>, vector<24x32xf32>, vector<8x32xf32> -> vector<8x32xf32>
    %cst_76 = arith.constant dense<0.000000e+00> : vector<8x32xf32>
    %133 = tpu.matmul %100, %94, %cst_76 {dimension_numbers = #tpu.dot_dimension_numbers<[1], [0], [0], [1], [0, 0, 1, 1], [], []>} : vector<8x24xf32>, vector<24x32xf32>, vector<8x32xf32> -> vector<8x32xf32>
    %cst_77 = arith.constant dense<0.000000e+00> : vector<16x32xf32>
    %134 = tpu.matmul %112, %94, %cst_77 {dimension_numbers = #tpu.dot_dimension_numbers<[1], [0], [0], [1], [0, 0, 1, 1], [], []>} : vector<16x24xf32>, vector<24x32xf32>, vector<16x32xf32> -> vector<16x32xf32>
    %cst_78 = arith.constant dense<0.000000e+00> : vector<24x32xf32>
    %135 = tpu.matmul %106, %133, %cst_78 {dimension_numbers = #tpu.dot_dimension_numbers<[1], [0], [0], [1], [0, 0, 1, 1], [], []>} : vector<24x8xf32>, vector<8x32xf32>, vector<24x32xf32> -> vector<24x32xf32>
    %cst_79 = arith.constant dense<0.000000e+00> : vector<24x32xf32>
    %136 = tpu.matmul %118, %134, %cst_79 {dimension_numbers = #tpu.dot_dimension_numbers<[1], [0], [0], [1], [0, 0, 1, 1], [], []>} : vector<24x16xf32>, vector<16x32xf32>, vector<24x32xf32> -> vector<24x32xf32>
    %137 = arith.addf %135, %136 : vector<24x32xf32>
    %c0_80 = arith.constant 0 : index
    %c0_81 = arith.constant 0 : index
    %138 = vector.load %arg27[%c0_80, %c0_81] : memref<24x1xf32, #tpu.memory_space<vmem>>, vector<24x1xf32>
    %139 = vector.broadcast %138 : vector<24x1xf32> to vector<24x32xf32>
    %140 = arith.mulf %137, %139 : vector<24x32xf32>
    %c0_82 = arith.constant 0 : index
    %c0_83 = arith.constant 0 : index
    %141 = vector.load %arg33[%c0_82, %c0_83] : memref<72x32xf32, #tpu.memory_space<vmem>>, vector<16x32xf32>
    tpu.vector_store %arg33[%c0_82, %c0_83], %35 {strides = array<i32>} : memref<72x32xf32, #tpu.memory_space<vmem>>, vector<16x32xf32>,
    %c16 = arith.constant 16 : index
    %c0_84 = arith.constant 0 : index
    %142 = vector.load %arg33[%c16, %c0_84] : memref<72x32xf32, #tpu.memory_space<vmem>>, vector<16x32xf32>
    tpu.vector_store %arg33[%c16, %c0_84], %82 {strides = array<i32>} : memref<72x32xf32, #tpu.memory_space<vmem>>, vector<16x32xf32>,
    %c32 = arith.constant 32 : index
    %c0_85 = arith.constant 0 : index
    %143 = vector.load %arg33[%c32, %c0_85] : memref<72x32xf32, #tpu.memory_space<vmem>>, vector<16x32xf32>
    tpu.vector_store %arg33[%c32, %c0_85], %129 {strides = array<i32>} : memref<72x32xf32, #tpu.memory_space<vmem>>, vector<16x32xf32>,
    %c48 = arith.constant 48 : index
    %c0_86 = arith.constant 0 : index
    %144 = vector.load %arg33[%c48, %c0_86] : memref<72x32xf32, #tpu.memory_space<vmem>>, vector<8x32xf32>
    tpu.vector_store %arg33[%c48, %c0_86], %38 {strides = array<i32>} : memref<72x32xf32, #tpu.memory_space<vmem>>, vector<8x32xf32>,
    %c56 = arith.constant 56 : index
    %c0_87 = arith.constant 0 : index
    %145 = vector.load %arg33[%c56, %c0_87] : memref<72x32xf32, #tpu.memory_space<vmem>>, vector<8x32xf32>
    tpu.vector_store %arg33[%c56, %c0_87], %85 {strides = array<i32>} : memref<72x32xf32, #tpu.memory_space<vmem>>, vector<8x32xf32>,
    %c64 = arith.constant 64 : index
    %c0_88 = arith.constant 0 : index
    %146 = vector.load %arg33[%c64, %c0_88] : memref<72x32xf32, #tpu.memory_space<vmem>>, vector<8x32xf32>
    tpu.vector_store %arg33[%c64, %c0_88], %132 {strides = array<i32>} : memref<72x32xf32, #tpu.memory_space<vmem>>, vector<8x32xf32>,
    %c0_89 = arith.constant 0 : index
    %c0_90 = arith.constant 0 : index
    %147 = vector.load %arg33[%c0_89, %c0_90] : memref<72x32xf32, #tpu.memory_space<vmem>>, vector<72x32xf32>
    %c0_91 = arith.constant 0 : index
    %c0_92 = arith.constant 0 : index
    %148 = vector.load %arg17[%c0_91, %c0_92] : memref<32x32xf32, #tpu.memory_space<vmem>>, vector<32x32xf32>
    %cst_93 = arith.constant dense<0.000000e+00> : vector<72x32xf32>
    %149 = tpu.matmul %147, %148, %cst_93 {dimension_numbers = #tpu.dot_dimension_numbers<[1], [0], [0], [1], [0, 0, 1, 1], [], []>} : vector<72x32xf32>, vector<32x32xf32>, vector<72x32xf32> -> vector<72x32xf32>
    %150 = vector.extract_strided_slice %149 {offsets = [0, 0], sizes = [16, 32], strides = [1, 1]} : vector<72x32xf32> to vector<16x32xf32>
    %c0_94 = arith.constant 0 : index
    %c0_95 = arith.constant 0 : index
    %151 = vector.load %arg20[%c0_94, %c0_95] : memref<16x1xf32, #tpu.memory_space<vmem>>, vector<16x1xf32>
    %152 = vector.broadcast %151 : vector<16x1xf32> to vector<16x32xf32>
    %153 = arith.mulf %150, %152 : vector<16x32xf32>
    %cst_96 = arith.constant 0.000000e+00 : f32
    %154 = vector.broadcast %cst_96 : f32 to vector<16x32xf32>
    %155 = arith.cmpf ogt, %153, %154 : vector<16x32xf32>
    %cst_97 = arith.constant 0.00999999977 : f32
    %156 = vector.broadcast %cst_97 : f32 to vector<16x32xf32>
    %157 = arith.mulf %156, %153 : vector<16x32xf32>
    %158 = arith.select %155, %153, %157 : vector<16x32xi1>, vector<16x32xf32>
    %cst_98 = arith.constant 5.000000e-01 : f32
    %159 = vector.broadcast %cst_98 : f32 to vector<16x32xf32>
    %160 = arith.mulf %159, %158 : vector<16x32xf32>
    %161 = vector.extract_strided_slice %149 {offsets = [16, 0], sizes = [16, 32], strides = [1, 1]} : vector<72x32xf32> to vector<16x32xf32>
    %c0_99 = arith.constant 0 : index
    %c0_100 = arith.constant 0 : index
    %162 = vector.load %arg22[%c0_99, %c0_100] : memref<16x1xf32, #tpu.memory_space<vmem>>, vector<16x1xf32>
    %163 = vector.broadcast %162 : vector<16x1xf32> to vector<16x32xf32>
    %164 = arith.mulf %161, %163 : vector<16x32xf32>
    %cst_101 = arith.constant 0.000000e+00 : f32
    %165 = vector.broadcast %cst_101 : f32 to vector<16x32xf32>
    %166 = arith.cmpf ogt, %164, %165 : vector<16x32xf32>
    %cst_102 = arith.constant 0.00999999977 : f32
    %167 = vector.broadcast %cst_102 : f32 to vector<16x32xf32>
    %168 = arith.mulf %167, %164 : vector<16x32xf32>
    %169 = arith.select %166, %164, %168 : vector<16x32xi1>, vector<16x32xf32>
    %cst_103 = arith.constant 3.000000e-01 : f32
    %170 = vector.broadcast %cst_103 : f32 to vector<16x32xf32>
    %171 = arith.mulf %170, %169 : vector<16x32xf32>
    %172 = arith.addf %160, %171 : vector<16x32xf32>
    %173 = vector.extract_strided_slice %149 {offsets = [32, 0], sizes = [16, 32], strides = [1, 1]} : vector<72x32xf32> to vector<16x32xf32>
    %c0_104 = arith.constant 0 : index
    %c0_105 = arith.constant 0 : index
    %174 = vector.load %arg24[%c0_104, %c0_105] : memref<16x1xf32, #tpu.memory_space<vmem>>, vector<16x1xf32>
    %175 = vector.broadcast %174 : vector<16x1xf32> to vector<16x32xf32>
    %176 = arith.mulf %173, %175 : vector<16x32xf32>
    %cst_106 = arith.constant 0.000000e+00 : f32
    %177 = vector.broadcast %cst_106 : f32 to vector<16x32xf32>
    %178 = arith.cmpf ogt, %176, %177 : vector<16x32xf32>
    %cst_107 = arith.constant 0.00999999977 : f32
    %179 = vector.broadcast %cst_107 : f32 to vector<16x32xf32>
    %180 = arith.mulf %179, %176 : vector<16x32xf32>
    %181 = arith.select %178, %176, %180 : vector<16x32xi1>, vector<16x32xf32>
    %cst_108 = arith.constant 2.000000e-01 : f32
    %182 = vector.broadcast %cst_108 : f32 to vector<16x32xf32>
    %183 = arith.mulf %182, %181 : vector<16x32xf32>
    %184 = arith.addf %172, %183 : vector<16x32xf32>
    %c0_109 = arith.constant 0 : index
    %c0_110 = arith.constant 0 : index
    %185 = vector.load %arg29[%c0_109, %c0_110] : memref<16x32xf32, #tpu.memory_space<vmem>>, vector<16x32xf32>
    tpu.vector_store %arg29[%c0_109, %c0_110], %184 {strides = array<i32>} : memref<16x32xf32, #tpu.memory_space<vmem>>, vector<16x32xf32>,
    %186 = vector.extract_strided_slice %149 {offsets = [48, 0], sizes = [8, 32], strides = [1, 1]} : vector<72x32xf32> to vector<8x32xf32>
    %c0_111 = arith.constant 0 : index
    %c0_112 = arith.constant 0 : index
    %187 = vector.load %arg19[%c0_111, %c0_112] : memref<8x1xf32, #tpu.memory_space<vmem>>, vector<8x1xf32>
    %188 = vector.broadcast %187 : vector<8x1xf32> to vector<8x32xf32>
    %189 = arith.mulf %186, %188 : vector<8x32xf32>
    %cst_113 = arith.constant 0.000000e+00 : f32
    %190 = vector.broadcast %cst_113 : f32 to vector<8x32xf32>
    %191 = arith.cmpf ogt, %189, %190 : vector<8x32xf32>
    %cst_114 = arith.constant 0.00999999977 : f32
    %192 = vector.broadcast %cst_114 : f32 to vector<8x32xf32>
    %193 = arith.mulf %192, %189 : vector<8x32xf32>
    %194 = arith.select %191, %189, %193 : vector<8x32xi1>, vector<8x32xf32>
    %cst_115 = arith.constant 5.000000e-01 : f32
    %195 = vector.broadcast %cst_115 : f32 to vector<8x32xf32>
    %196 = arith.mulf %195, %194 : vector<8x32xf32>
    %197 = vector.extract_strided_slice %149 {offsets = [56, 0], sizes = [8, 32], strides = [1, 1]} : vector<72x32xf32> to vector<8x32xf32>
    %c0_116 = arith.constant 0 : index
    %c0_117 = arith.constant 0 : index
    %198 = vector.load %arg21[%c0_116, %c0_117] : memref<8x1xf32, #tpu.memory_space<vmem>>, vector<8x1xf32>
    %199 = vector.broadcast %198 : vector<8x1xf32> to vector<8x32xf32>
    %200 = arith.mulf %197, %199 : vector<8x32xf32>
    %cst_118 = arith.constant 0.000000e+00 : f32
    %201 = vector.broadcast %cst_118 : f32 to vector<8x32xf32>
    %202 = arith.cmpf ogt, %200, %201 : vector<8x32xf32>
    %cst_119 = arith.constant 0.00999999977 : f32
    %203 = vector.broadcast %cst_119 : f32 to vector<8x32xf32>
    %204 = arith.mulf %203, %200 : vector<8x32xf32>
    %205 = arith.select %202, %200, %204 : vector<8x32xi1>, vector<8x32xf32>
    %cst_120 = arith.constant 3.000000e-01 : f32
    %206 = vector.broadcast %cst_120 : f32 to vector<8x32xf32>
    %207 = arith.mulf %206, %205 : vector<8x32xf32>
    %208 = arith.addf %196, %207 : vector<8x32xf32>
    %209 = vector.extract_strided_slice %149 {offsets = [64, 0], sizes = [8, 32], strides = [1, 1]} : vector<72x32xf32> to vector<8x32xf32>
    %c0_121 = arith.constant 0 : index
    %c0_122 = arith.constant 0 : index
    %210 = vector.load %arg23[%c0_121, %c0_122] : memref<8x1xf32, #tpu.memory_space<vmem>>, vector<8x1xf32>
    %211 = vector.broadcast %210 : vector<8x1xf32> to vector<8x32xf32>
    %212 = arith.mulf %209, %211 : vector<8x32xf32>
    %cst_123 = arith.constant 0.000000e+00 : f32
    %213 = vector.broadcast %cst_123 : f32 to vector<8x32xf32>
    %214 = arith.cmpf ogt, %212, %213 : vector<8x32xf32>
    %cst_124 = arith.constant 0.00999999977 : f32
    %215 = vector.broadcast %cst_124 : f32 to vector<8x32xf32>
    %216 = arith.mulf %215, %212 : vector<8x32xf32>
    %217 = arith.select %214, %212, %216 : vector<8x32xi1>, vector<8x32xf32>
    %cst_125 = arith.constant 2.000000e-01 : f32
    %218 = vector.broadcast %cst_125 : f32 to vector<8x32xf32>
    %219 = arith.mulf %218, %217 : vector<8x32xf32>
    %220 = arith.addf %208, %219 : vector<8x32xf32>
    %c0_126 = arith.constant 0 : index
    %c0_127 = arith.constant 0 : index
    %221 = vector.load %arg28[%c0_126, %c0_127] : memref<8x32xf32, #tpu.memory_space<vmem>>, vector<8x32xf32>
    tpu.vector_store %arg28[%c0_126, %c0_127], %220 {strides = array<i32>} : memref<8x32xf32, #tpu.memory_space<vmem>>, vector<8x32xf32>,
    %c0_128 = arith.constant 0 : index
    %c0_129 = arith.constant 0 : index
    %222 = vector.load %arg34[%c0_128, %c0_129] : memref<56x32xf32, #tpu.memory_space<vmem>>, vector<16x32xf32>
    tpu.vector_store %arg34[%c0_128, %c0_129], %46 {strides = array<i32>} : memref<56x32xf32, #tpu.memory_space<vmem>>, vector<16x32xf32>,
    %c16_130 = arith.constant 16 : index
    %c0_131 = arith.constant 0 : index
    %223 = vector.load %arg34[%c16_130, %c0_131] : memref<56x32xf32, #tpu.memory_space<vmem>>, vector<16x32xf32>
    tpu.vector_store %arg34[%c16_130, %c0_131], %93 {strides = array<i32>} : memref<56x32xf32, #tpu.memory_space<vmem>>, vector<16x32xf32>,
    %c32_132 = arith.constant 32 : index
    %c0_133 = arith.constant 0 : index
    %224 = vector.load %arg34[%c32_132, %c0_133] : memref<56x32xf32, #tpu.memory_space<vmem>>, vector<24x32xf32>
    tpu.vector_store %arg34[%c32_132, %c0_133], %140 {strides = array<i32>} : memref<56x32xf32, #tpu.memory_space<vmem>>, vector<24x32xf32>,
    %c0_134 = arith.constant 0 : index
    %c0_135 = arith.constant 0 : index
    %225 = vector.load %arg34[%c0_134, %c0_135] : memref<56x32xf32, #tpu.memory_space<vmem>>, vector<56x32xf32>
    %c0_136 = arith.constant 0 : index
    %c0_137 = arith.constant 0 : index
    %226 = vector.load %arg18[%c0_136, %c0_137] : memref<32x32xf32, #tpu.memory_space<vmem>>, vector<32x32xf32>
    %cst_138 = arith.constant dense<0.000000e+00> : vector<56x32xf32>
    %227 = tpu.matmul %225, %226, %cst_138 {dimension_numbers = #tpu.dot_dimension_numbers<[1], [0], [0], [1], [0, 0, 1, 1], [], []>} : vector<56x32xf32>, vector<32x32xf32>, vector<56x32xf32> -> vector<56x32xf32>
    %cst_139 = arith.constant 0.000000e+00 : f32
    %228 = vector.broadcast %cst_139 : f32 to vector<56x32xf32>
    %229 = arith.cmpf ogt, %227, %228 : vector<56x32xf32>
    %cst_140 = arith.constant 0.00999999977 : f32
    %230 = vector.broadcast %cst_140 : f32 to vector<56x32xf32>
    %231 = arith.mulf %230, %227 : vector<56x32xf32>
    %232 = arith.select %229, %227, %231 : vector<56x32xi1>, vector<56x32xf32>
    %233 = vector.extract_strided_slice %232 {offsets = [0, 0], sizes = [16, 32], strides = [1, 1]} : vector<56x32xf32> to vector<16x32xf32>
    %c0_141 = arith.constant 0 : index
    %c0_142 = arith.constant 0 : index
    %234 = vector.load %arg30[%c0_141, %c0_142] : memref<16x32xf32, #tpu.memory_space<vmem>>, vector<16x32xf32>
    tpu.vector_store %arg30[%c0_141, %c0_142], %233 {strides = array<i32>} : memref<16x32xf32, #tpu.memory_space<vmem>>, vector<16x32xf32>,
    %235 = vector.extract_strided_slice %232 {offsets = [16, 0], sizes = [16, 32], strides = [1, 1]} : vector<56x32xf32> to vector<16x32xf32>
    %c0_143 = arith.constant 0 : index
    %c0_144 = arith.constant 0 : index
    %236 = vector.load %arg31[%c0_143, %c0_144] : memref<16x32xf32, #tpu.memory_space<vmem>>, vector<16x32xf32>
    tpu.vector_store %arg31[%c0_143, %c0_144], %235 {strides = array<i32>} : memref<16x32xf32, #tpu.memory_space<vmem>>, vector<16x32xf32>,
    %237 = vector.extract_strided_slice %232 {offsets = [32, 0], sizes = [24, 32], strides = [1, 1]} : vector<56x32xf32> to vector<24x32xf32>
    %c0_145 = arith.constant 0 : index
    %c0_146 = arith.constant 0 : index
    %238 = vector.load %arg32[%c0_145, %c0_146] : memref<24x32xf32, #tpu.memory_space<vmem>>, vector<24x32xf32>
    tpu.vector_store %arg32[%c0_145, %c0_146], %237 {strides = array<i32>} : memref<24x32xf32, #tpu.memory_space<vmem>>, vector<24x32xf32>,
    return
  }
}

</mosaic_0001>

<bundles_post_ra>
// kernel: tpu_custom_call.1
= control target key start
LH: loop header
LB: loop body
LE: loop exit
PB: predicated region body
PF: predicated region fallthrough
CT: control target
= control target key end

     0   :  { %s3537_s6 = smov 1   ;;  %s3538_s10 = smov 2   ;;  %s4217_s0 = inlined_call_operand.smem [shape: u32[33], index: -1, kind: input, shape index: {}] }
   0x1   :  { %s3588_s5 = sld [smem:[%s4217_s0]]   ;;  %s3539_s14 = smov 3  }
   0x2   :  { %s3593_s9 = sld [smem:[%s4217_s0 + %s3537_s6]]   ;;  %s3540_s18 = smov 4  }
   0x3   :  { %s3598_s13 = sld [smem:[%s4217_s0 + %s3538_s10]]   ;;  %s3541_s22 = smov 5  }
   0x4   :  { %s3603_s17 = sld [smem:[%s4217_s0 + %s3539_s14]]   ;;  %s3542_s26 = smov 6  }
   0x5   :  { %s3608_s21 = sld [smem:[%s4217_s0 + %s3540_s18]]   ;;  %s3543_s30 = smov 7  }
   0x6   :  { %s3613_s25 = sld [smem:[%s4217_s0 + %s3541_s22]]   ;;  %s3544_s4 = smov 8  }
   0x7   :  { %4226 = sst [smem:[#allocation15_spill]] %s3588_s5  ;;  %s3545_s10 = smov 9  }
   0x8   :  { %s3618_s29 = sld [smem:[%s4217_s0 + %s3542_s26]]   ;;  %s3546_s15 = smov 10  }
   0x9   :  { %4227 = sst [smem:[#allocation16_spill]] %s3598_s13  ;;  %s3547_s20 = smov 11  }
   0xa   :  { %s3623_s3 = sld [smem:[%s4217_s0 + %s3543_s30]]   ;;  %s3548_s26 = smov 12  }
   0xb   :  { %4228 = sst [smem:[#allocation17_spill]] %s3608_s21  ;;  %s3549_s1 = smov 13  }
   0xc   :  { %s3628_s8 = sld [smem:[%s4217_s0 + %s3544_s4]]   ;;  %s3550_s7 = smov 14  }
   0xd   :  { %s3633_s14 = sld [smem:[%s4217_s0 + %s3545_s10]]   ;;  %s3552_s22 = smov 16  }
   0xe   :  { %4229 = sst [smem:[#allocation18_spill]] %s3618_s29  ;;  %s3553_s28 = smov 17  }
   0xf   :  { %s3638_s19 = sld [smem:[%s4217_s0 + %s3546_s15]]   ;;  %s3551_s15 = smov 15  }
  0x10   :  { %s3643_s24 = sld [smem:[%s4217_s0 + %s3547_s20]]   ;;  %s3556_s23 = smov 20  }
  0x11   :  { %s3648_s30 = sld [smem:[%s4217_s0 + %s3548_s26]]   ;;  %s3558_s10 = smov 22  }
  0x12   :  { %4230 = sst [smem:[#allocation19_spill]] %s3628_s8  ;;  %s3559_s16 = smov 23  }
  0x13   :  { %s3653_s6 = sld [smem:[%s4217_s0 + %s3549_s1]]   ;;  %s3557_s1 = smov 21  }
  0x14   :  { %s3658_s12 = sld [smem:[%s4217_s0 + %s3550_s7]]   ;;  %s3554_s7 = smov 18  }
  0x15   :  { %4231 = sst [smem:[#allocation20_spill]] %s3638_s19 }
  0x16   :  { %s3663_s20 = sld [smem:[%s4217_s0 + %s3551_s15]]   ;;  %s3555_s15 = smov 19  }
  0x17   :  { %4232 = sst [smem:[#allocation21_spill]] %s3648_s30 }
  0x18   :  { %s3668_s27 = sld [smem:[%s4217_s0 + %s3552_s22]]  }
  0x19   :  { %4233 = sst [smem:[#allocation22_spill]] %s3653_s6 }
  0x1a   :  { %4234 = sst [smem:[#allocation23_spill]] %s3658_s12 }
  0x1b   :  { %s3673_s4 = sld [smem:[%s4217_s0 + %s3553_s28]]  }
  0x1c   :  { %4235 = sst [smem:[#allocation24_spill]] %s3663_s20 }
  0x1d   :  { %s3678_s8 = sld [smem:[%s4217_s0 + %s3554_s7]]  }
  0x1e   :  { %4236 = sst [smem:[#allocation25_spill]] %s3668_s27 }
  0x1f   :  { %s2817_s19 = sld [smem:[%s4217_s0 + %s3555_s15]]  }
  0x20   :  { %s3686_s27 = sld [smem:[%s4217_s0 + %s3556_s23]]   ;;  %s3560_s23 = smov 24  }
  0x21   :  { %4237 = sst [smem:[#allocation26_spill]] %s3673_s4 }
  0x22   :  { %s3691_s4 = sld [smem:[%s4217_s0 + %s3557_s1]]   ;;  %s3561_s1 = smov 25  }
  0x23   :  { %4238 = sst [smem:[#allocation27_spill]] %s3678_s8 }
  0x24   :  { %s3696_s8 = sld [smem:[%s4217_s0 + %s3558_s10]]   ;;  %s3562_s10 = smov 26  }
  0x25   :  { %s3701_s29 = sld [smem:[%s4217_s0 + %s3559_s16]]   ;;  %s3563_s16 = smov 27  }
  0x26   :  { %s3706_s21 = sld [smem:[%s4217_s0 + %s3560_s23]]   ;;  %s3564_s23 = smov 28  }
  0x27   :  { %s3711_s20 = sld [smem:[%s4217_s0 + %s3561_s1]]   ;;  %s3565_s1 = smov 29  }
  0x28   :  { %s3716_s5 = sld [smem:[%s4217_s0 + %s3562_s10]]   ;;  %s3566_s10 = smov 30  }
  0x29   :  { %s3721_s12 = sld [smem:[%s4217_s0 + %s3563_s16]]   ;;  %s3567_s16 = smov 31  }
  0x2a   :  { %s3726_s13 = sld [smem:[%s4217_s0 + %s3564_s23]]   ;;  %s3568_s23 = smov 32  }
  0x2b   :  { %s3731_s6 = sld [smem:[%s4217_s0 + %s3565_s1]]  }
  0x2c   :  { %s3736_s30 = sld [smem:[%s4217_s0 + %s3566_s10]]  }
  0x2f   :  { %4239 = sst [smem:[#allocation28_spill]] %s3721_s12 }
  0x30   :  { %4240 = sst [smem:[#allocation29_spill]] %s3726_s13 }
  0x31   :  { %s3741_s12 = sld [smem:[%s4217_s0 + %s3567_s16]]  }
  0x32   :  { %s3746_s13 = sld [smem:[%s4217_s0 + %s3568_s23]]  }
  0x33   :  { %71 = vsyncpa [#allocation5], 0 }
  0x34   :  { %72 = vsyncpa [#allocation7], 0  ;;  %v3748_v0 = vld [vmem:[%s2817_s19] sm:$0xff]  ;;  %v145_v1 = vld [vmem:[%s3593_s9 + $0x8] sm:$0xff]  ;;  %v3569_v2 = vmov 0  }
  0x35   :  { %3420 = vset.pattern.permute.xlu1 %v3569_v2  ;;  %3419 = vset.pattern.permute.xlu0 %v3569_v2  ;;  %v194_v3 = vld [vmem:[%s3686_s27] sm:$0xff]  ;;  %v195_v6 = vld [vmem:[%s3686_s27 + $0x8] sm:$0xff] }
  0x36   :  { %188 = vperm.xlu0 %3419, %v3748_v0   ;;  %150 = vperm.xlu1 %3420, %v145_v1   ;;  %v144_v4 = vld [vmem:[%s3593_s9] sm:$0xff]  ;;  %v171_v8 = vld [vmem:[%s3603_s17 + $0x8] sm:$0xff] }
  0x37   :  { %v170_v5 = vld [vmem:[%s3603_s17] sm:$0xff] }
  0x38   :  { %v888_v7 = vld [vmem:[%s3691_s4] sm:$0xff] }
  0x3a   :  { %198 = vperm.xlu1 %3420, %v194_v3   ;;  %147 = vperm.xlu0 %3419, %v144_v4  }
  0x3e   :  { %173 = vperm.xlu1 %3420, %v170_v5   ;;  %203 = vperm.xlu0 %3419, %v195_v6  }
  0x3f   :  { %73 = vsyncpa [#allocation10], 0  ;;  %v895_v9 = vld [vmem:[%s3696_s8] sm:$0xff]  ;;  %v850_v11 = vld [vmem:[%s3613_s25 + $0x8] sm:$0xff]  ;;  %s4241_s0 = sld [smem:[#allocation28_spill]]  ;;  %s4242_s9 = sld [smem:[#allocation21_spill]]  ;;  %v132_v31 = vlaneseq }
  0x40   :  { %v849_v10 = vld [vmem:[%s3613_s25] sm:$0xff]  ;;  %v896_v12 = vld [vmem:[%s3696_s8 + $0x8] sm:$0xff]  ;;  %v1551_v17 = vld [vmem:[%s3633_s14 + $0x10] sm:$0xff]  ;;  %vm208_vm1 = vcmask 64512   ;;  %v3570_v39 = vmov 0.0   ;;  %s4244_s17 = sld [smem:[#allocation16_spill]] }
  0x41   :  { %v875_v13 = vld [vmem:[%s3623_s3 + $0x8] sm:$0xff]  ;;  %v874_v14 = vld [vmem:[%s3623_s3] sm:$0xff]  ;;  %v1583_v24 = vld [vmem:[%s3643_s24 + $0x10] sm:$0xff]  ;;  %v3784_v33 = vand.u32 127, %v132_v31  ;;  %v3841_v5 = vshrl.u32 %v132_v31, 7  ;;  %vm292_vm7 = vcmask 130048  }
  0x42   :  { %891 = vperm.xlu1 %3420, %v888_v7   ;;  %176 = vperm.xlu0 %3419, %v171_v8   ;;  %v1549_v15 = vld [vmem:[%s3633_s14] sm:$0xff]  ;;  %v1550_v18 = vld [vmem:[%s3633_s14 + $0x8] sm:$0xff]  ;;  %v3571_v8 = vmov 0.0|0.0   ;;  %vm3572_vm8 = vmmov 0   ;;  %s4246_s25 = sld [smem:[#allocation15_spill]]  ;;  %vm2288_vm13 = vcmask 261120  }
  0x43   :  { %v1602_v16 = vld [vmem:[%s3701_s29] sm:$0xff]  ;;  %v1610_v19 = vld [vmem:[%s3706_s21 + $0x8] sm:$0xff]  ;;  %3298 = vmatprep.subr.bf16.mxu1 %v3571_v8  ;;  %3061 = vmatprep.mubr.msk.f32.mxu1 %vm3572_vm8, %v3570_v39  ;;  %s4247_s29 = sld [smem:[#allocation24_spill]]  ;;  %s4248_s3 = sld [smem:[#allocation17_spill]] }
  0x44   :  { %v1609_v20 = vld [vmem:[%s3706_s21] sm:$0xff]  ;;  %v1582_v21 = vld [vmem:[%s3643_s24 + $0x8] sm:$0xff]  ;;  %s4245_s21 = sld [smem:[#allocation23_spill]]  ;;  %s4249_s8 = sld [smem:[#allocation18_spill]] }
  0x45   :  { %v1581_v22 = vld [vmem:[%s3643_s24] sm:$0xff]  ;;  %v826_v26 = vld [vmem:[%s3711_s20 + $0x8] sm:$0xff]  ;;  %v2269_v29 = vld [vmem:[%s4241_s0 + $0x10] sm:$0xff]  ;;  %s4250_s14 = sld [smem:[#allocation25_spill]]  ;;  %s4251_s19 = sld [smem:[#allocation20_spill]] }
  0x46   :  { %899 = vperm.xlu1 %3420, %v895_v9   ;;  %852 = vperm.xlu0 %3419, %v849_v10   ;;  %v825_v23 = vld [vmem:[%s3711_s20] sm:$0xff]  ;;  %v1525_v28 = vld [vmem:[%s3716_s5 + $0x8] sm:$0xff]  ;;  %s4252_s24 = sld [smem:[#allocation26_spill]]  ;;  %s4253_s20 = sld [smem:[#allocation19_spill]] }
  0x47   :  { %v1524_v25 = vld [vmem:[%s3716_s5] sm:$0xff]  ;;  %v2268_v30 = vld [vmem:[%s4241_s0 + $0x8] sm:$0xff]  ;;  %s4243_s5 = sld [smem:[#allocation22_spill]]  ;;  %s4254_s27 = sld [smem:[#allocation27_spill]] }
  0x48   :  { %v2267_v27 = vld [vmem:[%s4241_s0] sm:$0xff]  ;;  %s3573_s4 = smov [#allocation6]   ;;  %s3574_s28 = smov [#allocation9]  }
  0x49   :  { %v3782_v32 = vld [vmem:[%s4242_s9] sm:$0xff]  ;;  %s2738_s1 = sshll.u32 %s3573_s4, 4  ;;  %s2762_s2 = sshll.u32 %s3574_s28, 4  ;;  %s2739_s1 = int_to_ptr.vmem [resolvable:$true] %s2738_s1  ;;  %s4168_s2 = int_to_ptr.vmem [resolvable:$true] %s2762_s2 }
  0x4a   :  { %855 = vperm.xlu1 %3420, %v850_v11   ;;  %904 = vperm.xlu0 %3419, %v896_v12   ;;  %v130_v10 = vld [vmem:[%s4245_s21] sm:$0xff]  ;;  %s3421_s10 = scalar_lea.vmem %s2739_s1, 256  ;;  %p3426_p1 = scmp.lt.s32.totalorder %s2739_s1, %s2739_s1 }
  0x4b   :  { %p3422_p0 = scmp.ne.s32.totalorder %s2739_s1, %s3421_s10  ;;  %p3427_p2 = scmp.lt.s32.totalorder %s3421_s10, %s3421_s10 }
  0x4d   :  { %v192_v46 = vld [vmem:[%s4243_s5] sm:$0xff]  ;;  %v193_v50 = vld [vmem:[%s4243_s5 + $0x8] sm:$0xff]  ;;  %p3428_p3 = por %p3427_p2, %p3426_p1 }
  0x4e   :  { %880 = vperm.xlu1 %3420, %v875_v13   ;;  %877 = vperm.xlu0 %3419, %v874_v14  }
  0x4f   :  { %p3429_p4 = pnand %p3428_p3, %p3422_p0 }
  0x52   :  { %1553 = vperm.xlu1 %3420, %v1549_v15   ;;  %1605 = vperm.xlu0 %3419, %v1602_v16  }
  0x56   :  { %1559 = vperm.xlu1 %3420, %v1551_v17   ;;  %1556 = vperm.xlu0 %3419, %v1550_v18  }
  0x5a   :  { %1618 = vperm.xlu1 %3420, %v1610_v19   ;;  %1613 = vperm.xlu0 %3419, %v1609_v20  }
  0x5e   :  { %1588 = vperm.xlu1 %3420, %v1582_v21   ;;  %1585 = vperm.xlu0 %3419, %v1581_v22   ;;  %v2831_v21 = vld [vmem:[%s4246_s25] ss:$0 sm:$0xff] }
  0x5f   :  { %vm139_vm12 = vcmp.eq.s32.totalorder %v3841_v5, %v2831_v21 }
  0x62   :  { %829 = vperm.xlu1 %3420, %v825_v23   ;;  %1591 = vperm.xlu0 %3419, %v1583_v24  }
  0x66   :  { %1528 = vperm.xlu1 %3420, %v1524_v25   ;;  %834 = vperm.xlu0 %3419, %v826_v26   ;;  %v2832_v25 = vsel %vm139_vm12, 1.0, %v3570_v39 }
  0x6a   :  { %2272 = vperm.xlu1 %3420, %v2267_v27   ;;  %1533 = vperm.xlu0 %3419, %v1525_v28  }
  0x6e   :  { %2282 = vperm.xlu1 %3420, %v2269_v29   ;;  %2277 = vperm.xlu0 %3419, %v2268_v30  }
  0x72   :  { %2457 = vperm.xlu1 %3420, %v195_v6   ;;  %2452 = vperm.xlu0 %3419, %v194_v3   ;;  %v2835_v6 = vld [vmem:[%s4244_s17] ss:$0 sm:$0xff] }
  0x73   :  { %vm164_vm6 = vcmp.eq.s32.totalorder %v3841_v5, %v2835_v6 }
  0x76   :  { %2479 = vperm.xlu1 %3420, %v896_v12   ;;  %2474 = vperm.xlu0 %3419, %v895_v9   ;;  %v131_v9 = vld [vmem:[%s4245_s21 + $0x8] sm:$0xff]  ;;  %v3853_v12 = vadd.s32 8, %v3841_v5 }
  0x77   :  { %v3302_v23 = vpack.c.bf16 %v131_v9, %v130_v10 }
  0x78   :  { %vm165_vm9 = vcmp.eq.s32.totalorder %v3853_v12, %v2835_v6 }
  0x7a   :  { %2534 = vperm.xlu1 %3420, %v888_v7   ;;  %2523 = vperm.xlu0 %3419, %v3748_v0   ;;  %v2836_v7 = vsel %vm164_vm6, 1.0, %v3570_v39 }
  0x7e   :  { %2503 = vperm.xlu1 %3420, %v1610_v19   ;;  %2498 = vperm.xlu0 %3419, %v1609_v20   ;;  %v2837_v20 = vsel %vm165_vm9, 1.0, %v3570_v39 }
  0x82   :  { %2546 = vperm.xlu0 %3419, %v1602_v16  }
  0xb5   :  { %v189_v34 = vpop.permute.xlu0 %188  ;;  %v151_v35 = vpop.permute.xlu1 %150 }
  0xb6   :  { %v191_v36 = vmul.f32 %v189_v34, %v3782_v32  ;;  %vm153_vm0 = vcmp.eq.s32.totalorder %v3784_v33, %v151_v35 }
  0xb7   :  { %v3789_v40 = vsel %vm153_vm0, 1.0, %v3570_v39 }
  0xb8   :  { %3038 = vmatprep.subr.mxu0 %v191_v36 }
  0xb9   :  { %3039 = vmatpush3.msra.mxu0 %v191_v36  ;;  %v199_v37 = vpop.permute.xlu1 %198  ;;  %v148_v38 = vpop.permute.xlu0 %147 }
  0xba   :  { %vm152_vm2 = vcmp.eq.s32.totalorder %v3784_v33, %v148_v38  ;;  %v206_v17 = vmul.f32 %v199_v37, %v192_v46 }
  0xbb   :  { %v3793_v41 = vsel %vm152_vm2, 1.0, %v3570_v39 }
  0xbc   :  { %3040 = vmatprep.mubr.msk.f32.mxu0 %vm208_vm1, %v3793_v41 }
  0xbd   :  { %v174_v42 = vpop.permute.xlu1 %173  ;;  %v204_v43 = vpop.permute.xlu0 %203  ;;  %3041 = vmatmul.mubr.msk.f32.vlgmr.msra.gmra.mrb[0].mxu0 %vm208_vm1, %v3789_v40 }
  0xbe   :  { %3047 = vmatprep.mubr.msk.f32.mxu0 %vm292_vm7, %v2836_v7  ;;  %v207_v15 = vmul.f32 %v204_v43, %v193_v50  ;;  %vm178_vm10 = vcmp.eq.s32.totalorder %v3784_v33, %v174_v42 }
  0xbf   :  { %v2838_v22 = vsel %vm178_vm10, 1.0, %v3570_v39 }
  0xc0   :  { %v3294_v19 = vpack.c.bf16 %v207_v15, %v206_v17 }
  0xc1   :  { %v3799_v44 = vpop.permute.xlu1 %891  ;;  %v3801_v45 = vpop.permute.xlu0 %176 }
  0xc2   :  { %vm179_vm11 = vcmp.eq.s32.totalorder %v3784_v33, %v3801_v45  ;;  %v894_v35 = vmul.f32 %v3799_v44, %v3782_v32 }
  0xc3   :  { %v2839_v24 = vsel %vm179_vm11, 1.0, %v3570_v39 }
  0xc5   :  { %v900_v47 = vpop.permute.xlu1 %899  ;;  %v3804_v48 = vpop.permute.xlu0 %852 }
  0xc6   :  { %v907_v49 = vmul.f32 %v900_v47, %v192_v46  ;;  %vm857_vm14 = vcmp.eq.s32.totalorder %v3784_v33, %v3804_v48  ;;  %v840_v48 = vld [vmem:[%s4247_s29 + $0x8] sm:$0xff] }
  0xc7   :  { %v3882_v36 = vsel %vm857_vm14, 1.0, %v3570_v39 }
  0xc9   :  { %v3807_v51 = vpop.permute.xlu1 %855  ;;  %v905_v52 = vpop.permute.xlu0 %904 }
  0xca   :  { %v908_v53 = vmul.f32 %v905_v52, %v193_v50  ;;  %vm858_vm15 = vcmp.eq.s32.totalorder %v3784_v33, %v3807_v51 }
  0xcb   :  { %v3890_v37 = vsel %vm858_vm15, 1.0, %v3570_v39 }
  0xcc   :  { %v3809_v54 = vpack.c.bf16 %v908_v53, %v907_v49  ;;  %v839_v49 = vld [vmem:[%s4247_s29] sm:$0xff] }
  0xcd   :  { %v3811_v55 = vpop.permute.xlu1 %880  ;;  %v3813_v56 = vpop.permute.xlu0 %877 }
  0xce   :  { %vm882_vm0 = vcmp.eq.s32.totalorder %v3784_v33, %v3813_v56  ;;  %vm883_vm2 = vcmp.eq.s32.totalorder %v3784_v33, %v3811_v55 }
  0xcf   :  { %v2861_v6 = vsel %vm882_vm0, 1.0, %v3570_v39  ;;  %v3915_v56 = vsel %vm883_vm2, 1.0, %v3570_v39  ;;  %vm1715_vm0 = vcmask 195584  }
  0xd1   :  { %v3815_v57 = vpop.permute.xlu1 %1553  ;;  %v3817_v58 = vpop.permute.xlu0 %1605 }
  0xd2   :  { %v1608_v21 = vmul.f32 %v3817_v58, %v3782_v32  ;;  %vm1561_vm11 = vcmp.eq.s32.totalorder %v3784_v33, %v3815_v57 }
  0xd5   :  { %v3819_v59 = vpop.permute.xlu1 %1559  ;;  %v3821_v60 = vpop.permute.xlu0 %1556 }
  0xd6   :  { %vm1562_vm12 = vcmp.eq.s32.totalorder %v3784_v33, %v3821_v60  ;;  %vm1563_vm14 = vcmp.eq.s32.totalorder %v3784_v33, %v3819_v59 }
  0xd7   :  { %v3956_v32 = vsel %vm1562_vm12, 1.0, %v3570_v39  ;;  %v3965_v57 = vsel %vm1563_vm14, 1.0, %v3570_v39 }
  0xd9   :  { %v1619_v61 = vpop.permute.xlu1 %1618  ;;  %v1614_v62 = vpop.permute.xlu0 %1613 }
  0xda   :  { %v3823_v63 = vmul.f32 %v1619_v61, %v193_v50  ;;  %v3825_v0 = vmul.f32 %v1614_v62, %v192_v46  ;;  %v2854_v62 = vld [vmem:[%s4248_s3] ss:$0 sm:$0xff] }
  0xdb   :  { %vm846_vm6 = vcmp.eq.s32.totalorder %v3841_v5, %v2854_v62 }
  0xdc   :  { %v3339_v1 = vpack.c.bf16 %v3823_v63, %v3825_v0  ;;  %v2307_v0 = vld [vmem:[%s4252_s24] sm:$0xff] }
  0xdd   :  { %v3829_v2 = vpop.permute.xlu1 %1588  ;;  %v3831_v3 = vpop.permute.xlu0 %1585 }
  0xde   :  { %vm1594_vm3 = vcmp.eq.s32.totalorder %v3784_v33, %v3829_v2  ;;  %vm1593_vm4 = vcmp.eq.s32.totalorder %v3784_v33, %v3831_v3 }
  0xdf   :  { %v4026_v63 = vsel %vm1594_vm3, 1.0, %v3570_v39 }
  0xe1   :  { %v3837_v4 = vpop.permute.xlu0 %1591 }
  0xe2   :  { %vm1595_vm5 = vcmp.eq.s32.totalorder %v3784_v33, %v3837_v4 }
  0xe3   :  { %v4040_v3 = vsel %vm1595_vm5, 1.0, %v3570_v39 }
 0x190   :  { %v3042_v11 = vpop.f32.mrb[0].mxu0 }
 0x191   :  { %v291_v13 = vmul.f32 %v3042_v11, %v131_v9  ;;  %v281_v14 = vpop.f32.mrb[1].mxu0  ;;  %v830_v11 = vpop.permute.xlu1 %829 }
 0x192   :  { %v290_v16 = vmul.f32 %v281_v14, %v130_v10 }
 0x194   :  { %v3290_v18 = vpack.c.bf16 %v291_v13, %v290_v16 }
 0x196   :  { %3291 = vmatprep.subr.bf16.mxu0 %v3290_v18 }
 0x197   :  { %3293 = vmatpush3.bf16.msra.mxu0 %v3290_v18 }
 0x198   :  { %3295 = vmatprep.subr.bf16.mxu0 %v3294_v19 }
 0x19a   :  { %3048 = vmatmul.mubr.msk.f32.vlgmr.msra.gmra.mrb[2].mxu0 %vm292_vm7, %v2837_v20 }
 0x19b   :  { %3297 = vmatpush3.bf16.msra.mxu0 %v3294_v19  ;;  %3054 = vmatprep.mubr.msk.f32.mxu0 %vm292_vm7, %v2838_v22 }
 0x19c   :  { %3301 = vmatprep.subr.bf16.mxu0 %v3571_v8 }
 0x19e   :  { %3055 = vmatmul.mubr.msk.f32.vlgmr.msra.gmra.mrb[4].mxu0 %vm292_vm7, %v2839_v24 }
 0x19f   :  { %3303 = vmatpush3.bf16.msra.mxu0 %v3302_v23  ;;  %3068 = vmatprep.mubr.msk.f32.mxu0 %vm3572_vm8, %v3570_v39 }
 0x1a2   :  { %3069 = vmatmul.mubr.msk.f32.vlgmr.msra.gmra.mrb[6].mxu0 %vm292_vm7, %v2832_v25 }
 0x1a3   :  { %3082 = vmatprep.mubr.msk.f32.mxu0 %vm292_vm7, %v2838_v22  ;;  %v3947_v22 = vsel %vm1561_vm11, 1.0, %v3570_v39 }
 0x26d   :  { %v3049_v26 = vpop.f32.mrb[2].mxu0 }
 0x26e   :  { %2290 = vst.msk [vmem:[#allocation2 + $0x8] sm:$0xff] %vm2288_vm13, %v3049_v26  ;;  %v365_v27 = vpop.f32.mrb[3].mxu0 }
 0x26f   :  { %2289 = vst.msk [vmem:[#allocation2] sm:$0xff] %vm2288_vm13, %v365_v27 }
 0x271   :  { %v3056_v28 = vpop.f32.mrb[4].mxu0 }
 0x272   :  { %v456_v29 = vmul.f32 %v3056_v28, %v131_v9  ;;  %v446_v30 = vpop.f32.mrb[5].mxu0  ;;  %v835_v9 = vpop.permute.xlu0 %834 }
 0x273   :  { %v455_v31 = vmul.f32 %v446_v30, %v130_v10 }
 0x275   :  { %v3299_v34 = vpack.c.bf16 %v456_v29, %v455_v31  ;;  %v596_v38 = vpop.f32.mrb[6].mxu0  ;;  %v3975_v31 = vld [vmem:[%s4250_s14] sm:$0xff]  ;;  %v2299_v4 = vld [vmem:[#allocation2 + $0x8] sm:$0xff] }
 0x276   :  { %v3070_v42 = vpop.f32.mrb[7].mxu0  ;;  %v2298_v33 = vld [vmem:[#allocation2] sm:$0xff] }
 0x277   :  { %3300 = vmatpush3.bf16.msra.mxu1 %v3299_v34  ;;  %v3978_v34 = vld [vmem:[%s4250_s14 + $0x8] sm:$0xff] }
 0x278   :  { %3305 = vmatprep.subr.bf16.mxu1 %v3302_v23 }
 0x27a   :  { %3062 = vmatmul.mubr.msk.f32.vlgmr.msra.gmra.mrb[0].mxu1 %vm292_vm7, %v2832_v25 }
 0x27b   :  { %3307 = vmatpush3.bf16.msra.mxu1 %v3302_v23  ;;  %3075 = vmatprep.mubr.msk.f32.mxu1 %vm292_vm7, %v2836_v7 }
 0x27c   :  { %3090 = vmatprep.subr.mxu1 %v894_v35 }
 0x27e   :  { %3076 = vmatmul.mubr.msk.f32.vlgmr.msra.gmra.mrb[2].mxu1 %vm292_vm7, %v2837_v20 }
 0x27f   :  { %3091 = vmatpush3.msra.mxu1 %v894_v35  ;;  %3092 = vmatprep.mubr.msk.f32.mxu1 %vm208_vm1, %v3882_v36 }
 0x282   :  { %3093 = vmatmul.mubr.msk.f32.vlgmr.msra.gmra.mrb[4].mxu1 %vm208_vm1, %v3890_v37 }
 0x34d   :  { %v526_v43 = vpop.f32.mrb[0].mxu1 }
 0x34e   :  { %2295 = vst.msk [vmem:[#allocation2 + $0x30] sm:$0xff] %vm2288_vm13, %v526_v43  ;;  %v3063_v44 = vpop.f32.mrb[1].mxu1 }
 0x351   :  { %v3077_v45 = vpop.f32.mrb[2].mxu1 }
 0x352   :  { %v666_v46 = vpop.f32.mrb[3].mxu1 }
 0x353   :  { %v3308_v47 = vpack.c.bf16 %v3077_v45, %v666_v46 }
 0x355   :  { %3309 = vmatprep.subr.bf16.mxu0 %v3308_v47  ;;  %v3094_v50 = vpop.f32.mrb[4].mxu1 }
 0x356   :  { %v991_v51 = vmul.f32 %v3094_v50, %v840_v48  ;;  %3311 = vmatpush3.bf16.msra.mxu0 %v3308_v47  ;;  %v981_v52 = vpop.f32.mrb[5].mxu1  ;;  %v3989_v47 = vld [vmem:[%s4250_s14 + $0x10] sm:$0xff] }
 0x357   :  { %v990_v53 = vmul.f32 %v981_v52, %v839_v49  ;;  %3085 = vmatprep.subr.mxu0 %v596_v38  ;;  %v2310_v52 = vld [vmem:[%s4252_s24 + $0x18] sm:$0xff] }
 0x359   :  { %v3312_v61 = vpack.c.bf16 %v991_v51, %v990_v53  ;;  %3083 = vmatmul.mubr.msk.f32.vlgmr.msra.gmra.mrb[8].mxu0 %vm292_vm7, %v2839_v24  ;;  %v4000_v51 = vpack.c.bf16 %v3978_v34, %v3975_v31 }
 0x35a   :  { %3086 = vmatpush3.msra.mxu0 %v596_v38  ;;  %3087 = vmatprep.mubr.msk.f32.mxu0 %vm208_vm1, %v3793_v41  ;;  %v3324_v41 = vpack.c.bf16 %v840_v48, %v839_v49  ;;  %v2882_v38 = vld [vmem:[%s4251_s19] ss:$0 sm:$0xff] }
 0x35b   :  { %3313 = vmatprep.subr.bf16.mxu1 %v3312_v61  ;;  %3317 = vmatprep.subr.bf16.mxu0 %v3809_v54  ;;  %vm1575_vm15 = vcmp.eq.s32.totalorder %v3841_v5, %v2882_v38  ;;  %vm1576_vm2 = vcmp.eq.s32.totalorder %v3853_v12, %v2882_v38 }
 0x35c   :  { %3315 = vmatpush3.bf16.msra.mxu1 %v3312_v61 }
 0x35d   :  { %3320 = vmatprep.subr.bf16.mxu1 %v3571_v8 }
 0x361   :  { %3088 = vmatmul.mubr.msk.f32.vlgmr.msra.gmra.mrb[8].mxu0 %vm208_vm1, %v3789_v40  ;;  %v2855_v40 = vsel %vm846_vm6, 1.0, %v3570_v39 }
 0x362   :  { %3319 = vmatpush3.bf16.msra.mxu0 %v3809_v54  ;;  %3106 = vmatprep.mubr.msk.f32.mxu0 %vm292_vm7, %v2861_v6  ;;  %v2858_v54 = vld [vmem:[%s4249_s8] ss:$0 sm:$0xff] }
 0x363   :  { %3323 = vmatprep.subr.bf16.mxu0 %v3571_v8  ;;  %vm868_vm9 = vcmp.eq.s32.totalorder %v3841_v5, %v2858_v54  ;;  %vm869_vm10 = vcmp.eq.s32.totalorder %v3853_v12, %v2858_v54  ;;  %v4014_v12 = vsel %vm1593_vm4, 1.0, %v3570_v39 }
 0x364   :  { %v2859_v55 = vsel %vm868_vm9, 1.0, %v3570_v39  ;;  %v2860_v7 = vsel %vm869_vm10, 1.0, %v3570_v39 }
 0x365   :  { %3107 = vmatmul.mubr.msk.f32.vlgmr.msra.gmra.mrb[10].mxu0 %vm292_vm7, %v3915_v56  ;;  %3099 = vmatprep.mubr.msk.f32.mxu1 %vm292_vm7, %v2859_v55 }
 0x366   :  { %3325 = vmatpush3.bf16.msra.mxu0 %v3324_v41  ;;  %3120 = vmatprep.mubr.msk.f32.mxu0 %vm3572_vm8, %v3570_v39 }
 0x367   :  { %3100 = vmatmul.mubr.msk.f32.vlgmr.msra.gmra.mrb[6].mxu1 %vm292_vm7, %v2860_v7 }
 0x368   :  { %3113 = vmatprep.mubr.msk.f32.mxu1 %vm3572_vm8, %v3570_v39 }
 0x369   :  { %3121 = vmatmul.mubr.msk.f32.vlgmr.msra.gmra.mrb[12].mxu0 %vm292_vm7, %v2855_v40 }
 0x36a   :  { %3134 = vmatprep.mubr.msk.f32.mxu0 %vm292_vm7, %v2861_v6  ;;  %v1534_v6 = vpop.permute.xlu0 %1533 }
 0x434   :  { %v3089_v10 = vpop.f32.mrb[8].mxu0 }
 0x435   :  { %v838_v13 = vmul.f32 %v3089_v10, %v835_v9  ;;  %v816_v14 = vpop.f32.mrb[9].mxu0 }
 0x436   :  { %v837_v15 = vmul.f32 %v830_v11, %v816_v14 }
 0x437   :  { %2557 = vst.msk [vmem:[#allocation3 + $0x8] sm:$0xff] %vm2288_vm13, %v838_v13 }
 0x438   :  { %2556 = vst.msk [vmem:[#allocation3] sm:$0xff] %vm2288_vm13, %v837_v15  ;;  %v3108_v16 = vpop.f32.mrb[10].mxu0 }
 0x439   :  { %v1155_v17 = vmul.f32 %v3108_v16, %v840_v48  ;;  %v1145_v18 = vpop.f32.mrb[11].mxu0 }
 0x43a   :  { %v1154_v19 = vmul.f32 %v1145_v18, %v839_v49  ;;  %v3101_v58 = vpop.f32.mrb[6].mxu1  ;;  %v2883_v49 = vsel %vm1575_vm15, 1.0, %v3570_v39  ;;  %v2877_v18 = vld [vmem:[%s4253_s20] ss:$0 sm:$0xff] }
 0x43b   :  { %2292 = vst.msk [vmem:[#allocation2 + $0x18] sm:$0xff] %vm2288_vm13, %v3101_v58  ;;  %v1064_v59 = vpop.f32.mrb[7].mxu1  ;;  %vm1546_vm3 = vcmp.eq.s32.totalorder %v3841_v5, %v2877_v18  ;;  %v2304_v5 = vld [vmem:[#allocation2 + $0x30] sm:$0xff] }
 0x43c   :  { %v3321_v20 = vpack.c.bf16 %v1155_v17, %v1154_v19  ;;  %2291 = vst.msk [vmem:[#allocation2 + $0x10] sm:$0xff] %vm2288_vm13, %v1064_v59  ;;  %v1295_v60 = vpop.f32.mrb[12].mxu0 }
 0x43d   :  { %v3122_v23 = vpop.f32.mrb[13].mxu0 }
 0x43e   :  { %3322 = vmatpush3.bf16.msra.mxu1 %v3321_v20 }
 0x43f   :  { %3327 = vmatprep.subr.bf16.mxu1 %v3324_v41 }
 0x441   :  { %3114 = vmatmul.mubr.msk.f32.vlgmr.msra.gmra.mrb[8].mxu1 %vm292_vm7, %v2855_v40 }
 0x442   :  { %3329 = vmatpush3.bf16.msra.mxu1 %v3324_v41  ;;  %3127 = vmatprep.mubr.msk.f32.mxu1 %vm292_vm7, %v2859_v55  ;;  %v2301_v62 = vld [vmem:[#allocation2 + $0x18] sm:$0xff] }
 0x443   :  { %3142 = vmatprep.subr.mxu1 %v3570_v39  ;;  %v2300_v61 = vld [vmem:[#allocation2 + $0x10] sm:$0xff] }
 0x445   :  { %3128 = vmatmul.mubr.msk.f32.vlgmr.msra.gmra.mrb[10].mxu1 %vm292_vm7, %v2860_v7 }
 0x446   :  { %3143 = vmatpush3.msra.mxu1 %v1608_v21  ;;  %3144 = vmatprep.mubr.msk.f32.mxu1 %vm3572_vm8, %v3570_v39 }
 0x447   :  { %3341 = vmatprep.subr.bf16.mxu1 %v3571_v8 }
 0x449   :  { %3145 = vmatmul.mubr.msk.f32.vlgmr.msra.gmra.mrb[12].mxu1 %vm208_vm1, %v3947_v22 }
 0x44a   :  { %3147 = vmatprep.mubr.msk.f32.mxu1 %vm3572_vm8, %v3570_v39 }
 0x44d   :  { %3148 = vmatmul.mubr.msk.f32.gmra.mrb[14].mxu1 %vm208_vm1, %v3956_v32 }
 0x44e   :  { %3150 = vmatprep.mubr.msk.f32.mxu1 %vm3572_vm8, %v3570_v39 }
 0x451   :  { %3151 = vmatmul.mubr.msk.f32.gmra.mrb[16].mxu1 %vm208_vm1, %v3965_v57 }
 0x452   :  { %3181 = vmatprep.mubr.msk.f32.mxu1 %vm3572_vm8, %v3570_v39 }
 0x514   :  { %v1225_v24 = vpop.f32.mrb[8].mxu1 }
 0x515   :  { %2296 = vst.msk [vmem:[#allocation2 + $0x38] sm:$0xff] %vm2288_vm13, %v1225_v24  ;;  %v3115_v25 = vpop.f32.mrb[9].mxu1 }
 0x518   :  { %v3129_v26 = vpop.f32.mrb[10].mxu1 }
 0x519   :  { %v1365_v27 = vpop.f32.mrb[11].mxu1 }
 0x51a   :  { %v3330_v28 = vpack.c.bf16 %v3129_v26, %v1365_v27  ;;  %v4086_v27 = vpop.permute.xlu0 %2277 }
 0x51c   :  { %3331 = vmatprep.subr.bf16.mxu0 %v3330_v28  ;;  %v1698_v29 = vpop.f32.mrb[12].mxu1 }
 0x51d   :  { %3333 = vmatpush3.bf16.msra.mxu0 %v3330_v28  ;;  %v3146_v30 = vpop.f32.mrb[13].mxu1  ;;  %v1712_v42 = vmul.f32 %v1698_v29, %v3975_v31  ;;  %v2305_v28 = vld [vmem:[#allocation2 + $0x38] sm:$0xff] }
 0x51e   :  { %3137 = vmatprep.subr.mxu0 %v1295_v60 }
 0x520   :  { %3135 = vmatmul.mubr.msk.f32.vlgmr.msra.gmra.mrb[14].mxu0 %vm292_vm7, %v3915_v56  ;;  %v1703_v35 = vpop.f32.mrb[14].mxu1  ;;  %v1529_v56 = vpop.permute.xlu1 %1528 }
 0x521   :  { %v1713_v43 = vmul.f32 %v1703_v35, %v3978_v34  ;;  %3139 = vmatprep.mubr.msk.f32.mxu0 %vm208_vm1, %v3882_v36  ;;  %v3149_v44 = vpop.f32.mrb[15].mxu1  ;;  %3138 = vmatpush3.msra.mxu0 %v1295_v60  ;;  %v2884_v36 = vsel %vm1576_vm2, 1.0, %v3570_v39  ;;  %v2878_v60 = vsel %vm1546_vm3, 1.0, %v3570_v39 }
 0x523   :  { %v3334_v45 = vpack.c.bf16 %v1713_v43, %v1712_v42 }
 0x524   :  { %v1708_v46 = vpop.f32.mrb[16].mxu1  ;;  %v4080_v25 = vpop.permute.xlu1 %2272 }
 0x525   :  { %v3152_v48 = vpop.f32.mrb[17].mxu1  ;;  %3335 = vmatprep.subr.bf16.mxu0 %v3334_v45  ;;  %v1714_v50 = vmul.f32 %v1708_v46, %v3989_v47 }
 0x528   :  { %3140 = vmatmul.mubr.msk.f32.vlgmr.msra.gmra.mrb[14].mxu0 %vm208_vm1, %v3890_v37  ;;  %v2309_v37 = vld [vmem:[%s4252_s24 + $0x10] sm:$0xff]  ;;  %v4095_v29 = vpop.permute.xlu1 %2282 }
 0x529   :  { %3337 = vmatpush3.bf16.msra.mxu0 %v3334_v45  ;;  %3159 = vmatprep.mubr.msk.f32.mxu0 %vm1715_vm0, %v2883_v49  ;;  %v3358_v53 = vpack.c.bf16 %v2310_v52, %v2309_v37 }
 0x52a   :  { %3157 = vmatprep.subr.mxu0 %v1714_v50 }
 0x52c   :  { %v2458_v43 = vpop.permute.xlu1 %2457 }
 0x52d   :  { %3158 = vmatpush3.msra.mxu0 %v1714_v50 }
 0x52e   :  { %3160 = vmatmul.mubr.msk.f32.vlgmr.msra.gmra.mrb[16].mxu0 %vm1715_vm0, %v2884_v36  ;;  %3338 = vmatprep.subr.bf16.mxu0 %v3571_v8 }
 0x52f   :  { %3340 = vmatpush3.bf16.msra.mxu0 %v3339_v1  ;;  %3166 = vmatprep.mubr.msk.f32.mxu0 %vm3572_vm8, %v3570_v39  ;;  %v2308_v1 = vld [vmem:[%s4252_s24 + $0x8] sm:$0xff] }
 0x530   :  { %3348 = vmatprep.subr.bf16.mxu0 %v4000_v51  ;;  %v3355_v2 = vpack.c.bf16 %v2308_v1, %v2307_v0 }
 0x532   :  { %3167 = vmatmul.mubr.msk.f32.vlgmr.msra.gmra.mrb[18].mxu0 %vm292_vm7, %v4014_v12 }
 0x533   :  { %3169 = vmatprep.mubr.msk.f32.mxu0 %vm3572_vm8, %v3570_v39  ;;  %3350 = vmatpush3.bf16.msra.mxu0 %v4000_v51 }
 0x534   :  { %3197 = vmatprep.subr.mxu0 %v3989_v47 }
 0x536   :  { %3170 = vmatmul.mubr.msk.f32.gmra.mrb[20].mxu0 %vm292_vm7, %v4026_v63 }
 0x537   :  { %3172 = vmatprep.mubr.msk.f32.mxu0 %vm3572_vm8, %v3570_v39  ;;  %3198 = vmatpush3.msra.mxu0 %v3989_v47 }
 0x538   :  { %3354 = vmatprep.subr.bf16.mxu0 %v3571_v8 }
 0x53a   :  { %3173 = vmatmul.mubr.msk.f32.gmra.mrb[22].mxu0 %vm292_vm7, %v4040_v3 }
 0x53b   :  { %3199 = vmatprep.mubr.msk.f32.mxu0 %vm1715_vm0, %v2883_v49 }
 0x53e   :  { %3200 = vmatmul.mubr.msk.f32.vlgmr.msra.gmra.mrb[24].mxu0 %vm1715_vm0, %v2884_v36 }
 0x53f   :  { %3356 = vmatpush3.bf16.msra.mxu0 %v3355_v2  ;;  %3234 = vmatprep.mubr.msk.f32.mxu0 %vm3572_vm8, %v3570_v39 }
 0x540   :  { %3357 = vmatprep.subr.bf16.mxu0 %v3571_v8 }
 0x543   :  { %3359 = vmatpush3.bf16.msra.mxu0 %v3358_v53 }
 0x546   :  { %3235 = vmatmul.mubr.msk.f32.vlgmr.msra.gmra.mrb[26].mxu0 %vm2288_vm13, %v2298_v33 }
 0x547   :  { %3237 = vmatprep.mubr.msk.f32.mxu0 %vm3572_vm8, %v3570_v39 }
 0x54a   :  { %3238 = vmatmul.mubr.msk.f32.gmra.mrb[28].mxu0 %vm2288_vm13, %v2299_v4 }
 0x54b   :  { %3240 = vmatprep.mubr.msk.f32.mxu0 %vm3572_vm8, %v3570_v39 }
 0x54e   :  { %3241 = vmatmul.mubr.msk.f32.gmra.mrb[30].mxu0 %vm2288_vm13, %v2300_v61 }
 0x54f   :  { %3243 = vmatprep.mubr.msk.f32.mxu0 %vm3572_vm8, %v3570_v39 }
 0x552   :  { %3244 = vmatmul.mubr.msk.f32.gmra.mrb[32].mxu0 %vm2288_vm13, %v2301_v62 }
 0x553   :  { %3246 = vmatprep.mubr.msk.f32.mxu0 %vm3572_vm8, %v3570_v39 }
 0x5fb   :  { %v3141_v41 = vpop.f32.mrb[14].mxu0 }
 0x5fc   :  { %v1537_v40 = vmul.f32 %v3141_v41, %v1534_v6  ;;  %v1515_v54 = vpop.f32.mrb[15].mxu0 }
 0x5fd   :  { %v1536_v55 = vmul.f32 %v1529_v56, %v1515_v54 }
 0x5fe   :  { %2559 = vst.msk [vmem:[#allocation3 + $0x18] sm:$0xff] %vm2288_vm13, %v1537_v40 }
 0x5ff   :  { %2558 = vst.msk [vmem:[#allocation3 + $0x10] sm:$0xff] %vm2288_vm13, %v1536_v55 }
 0x601   :  { %v3161_v7 = vpop.f32.mrb[16].mxu0 }
 0x602   :  { %2294 = vst.msk [vmem:[#allocation2 + $0x28] sm:$0xff] %vm2288_vm13, %v3161_v7  ;;  %v1788_v9 = vpop.f32.mrb[17].mxu0 }
 0x603   :  { %2293 = vst.msk [vmem:[#allocation2 + $0x20] sm:$0xff] %vm2288_vm13, %v1788_v9 }
 0x605   :  { %v1872_v10 = vpop.f32.mrb[18].mxu0 }
 0x606   :  { %v3168_v11 = vpop.f32.mrb[19].mxu0  ;;  %v1886_v14 = vmul.f32 %v1872_v10, %v3975_v31 }
 0x609   :  { %v1877_v13 = vpop.f32.mrb[20].mxu0  ;;  %v2303_v58 = vld [vmem:[#allocation2 + $0x28] sm:$0xff] }
 0x60a   :  { %v1887_v15 = vmul.f32 %v1877_v13, %v3978_v34  ;;  %v3171_v16 = vpop.f32.mrb[21].mxu0  ;;  %v2302_v17 = vld [vmem:[#allocation2 + $0x20] sm:$0xff]  ;;  %v2453_v34 = vpop.permute.xlu0 %2452 }
 0x60b   :  { %3247 = vmatmul.mubr.msk.f32.gmra.mrb[34].mxu0 %vm2288_vm13, %v2302_v17 }
 0x60c   :  { %v3342_v19 = vpack.c.bf16 %v1887_v15, %v1886_v14  ;;  %3249 = vmatprep.mubr.msk.f32.mxu0 %vm3572_vm8, %v3570_v39 }
 0x60d   :  { %v1882_v20 = vpop.f32.mrb[22].mxu0 }
 0x60e   :  { %v3174_v21 = vpop.f32.mrb[23].mxu0  ;;  %3343 = vmatpush3.bf16.msra.mxu1 %v3342_v19  ;;  %v1888_v59 = vmul.f32 %v1882_v20, %v3989_v47  ;;  %v2475_v46 = vpop.permute.xlu0 %2474 }
 0x60f   :  { %3250 = vmatmul.mubr.msk.f32.gmra.mrb[36].mxu0 %vm2288_vm13, %v2303_v58  ;;  %3179 = vmatprep.subr.mxu1 %v3570_v39 }
 0x610   :  { %3252 = vmatprep.mubr.msk.f32.mxu0 %vm3572_vm8, %v3570_v39 }
 0x611   :  { %v3201_v23 = vpop.f32.mrb[24].mxu0 }
 0x612   :  { %3180 = vmatpush3.msra.mxu1 %v1888_v59  ;;  %v2098_v24 = vpop.f32.mrb[25].mxu0  ;;  %v2524_v56 = vpop.permute.xlu0 %2523 }
 0x613   :  { %3182 = vmatmul.mubr.msk.f32.vlgmr.msra.gmra.mrb[18].mxu1 %vm1715_vm0, %v2878_v60  ;;  %3344 = vmatprep.subr.bf16.mxu1 %v3571_v8  ;;  %v3352_v26 = vpack.c.bf16 %v3201_v23, %v2098_v24  ;;  %v2570_v24 = vld [vmem:[%s4254_s27] sm:$0xff] }
 0x614   :  { %3253 = vmatmul.mubr.msk.f32.gmra.mrb[38].mxu0 %vm2288_vm13, %v2304_v5  ;;  %3346 = vmatpush3.bf16.msra.mxu1 %v4000_v51  ;;  %v2571_v5 = vld [vmem:[%s4254_s27 + $0x8] sm:$0xff] }
 0x615   :  { %3255 = vmatprep.mubr.msk.f32.mxu0 %vm3572_vm8, %v3570_v39  ;;  %3188 = vmatprep.subr.mxu1 %v3570_v39 }
 0x616   :  { %3190 = vmatprep.mubr.msk.f32.mxu1 %vm3572_vm8, %v3570_v39  ;;  %v2499_v54 = vpop.permute.xlu0 %2498 }
 0x618   :  { %3256 = vmatmul.mubr.msk.f32.gmra.mrb[40].mxu0 %vm2288_vm13, %v2305_v28  ;;  %3189 = vmatpush3.msra.mxu1 %v3989_v47 }
 0x619   :  { %v2404_v30 = vpop.f32.mrb[26].mxu0  ;;  %3191 = vmatmul.mubr.msk.f32.vlgmr.msra.gmra.mrb[20].mxu1 %vm1715_vm0, %v2878_v60  ;;  %3351 = vmatprep.subr.bf16.mxu1 %v3571_v8 }
 0x61a   :  { %v3236_v31 = vpop.f32.mrb[27].mxu0  ;;  %3353 = vmatpush3.bf16.msra.mxu1 %v3352_v26  ;;  %3206 = vmatprep.mubr.msk.f32.mxu1 %vm3572_vm8, %v3570_v39  ;;  %v2460_v35 = vmul.f32 %v2453_v34, %v2404_v30 }
 0x61b   :  { %3215 = vmatprep.subr.mxu1 %v3570_v39  ;;  %3258 = vmatprep.mubr.msk.f32.mxu0 %vm3572_vm8, %v3570_v39 }
 0x61c   :  { %v2464_v44 = vmul.f32 0.01, %v2460_v35  ;;  %vm2462_vm4 = vcmp.gt.f32.partialorder %v2460_v35, 0.0 }
 0x61d   :  { %v2409_v38 = vpop.f32.mrb[28].mxu0  ;;  %3207 = vmatmul.mubr.msk.f32.vlgmr.msra.gmra.mrb[22].mxu1 %vm292_vm7, %v4014_v12  ;;  %v2480_v12 = vpop.permute.xlu1 %2479 }
 0x61e   :  { %v3239_v42 = vpop.f32.mrb[29].mxu0  ;;  %3209 = vmatprep.mubr.msk.f32.mxu1 %vm3572_vm8, %v3570_v39  ;;  %v2461_v45 = vmul.f32 %v2458_v43, %v2409_v38  ;;  %v2466_v50 = vsel %vm2462_vm4, %v2460_v35, %v2464_v44  ;;  %v3361_v38 = vpack.c.bf16 %v2571_v5, %v2570_v24  ;;  %v2572_v43 = vld [vmem:[%s4254_s27 + $0x10] sm:$0xff]  ;;  %v2573_v44 = vld [vmem:[%s4254_s27 + $0x18] sm:$0xff] }
 0x620   :  { %v2465_v36 = vmul.f32 0.01, %v2461_v45  ;;  %vm2463_vm6 = vcmp.gt.f32.partialorder %v2461_v45, 0.0 }
 0x621   :  { %v2414_v47 = vpop.f32.mrb[30].mxu0  ;;  %3210 = vmatmul.mubr.msk.f32.gmra.mrb[24].mxu1 %vm292_vm7, %v4026_v63  ;;  %v2468_v63 = vmul.f32 0.5, %v2466_v50  ;;  %v2535_v40 = vpop.permute.xlu1 %2534 }
 0x622   :  { %v2482_v48 = vmul.f32 %v2475_v46, %v2414_v47  ;;  %v3242_v49 = vpop.f32.mrb[31].mxu0  ;;  %3212 = vmatprep.mubr.msk.f32.mxu1 %vm3572_vm8, %v3570_v39  ;;  %v2467_v53 = vsel %vm2463_vm6, %v2461_v45, %v2465_v36 }
 0x623   :  { %v2469_v62 = vmul.f32 0.5, %v2467_v53  ;;  %v3364_v49 = vpack.c.bf16 %v2573_v44, %v2572_v43 }
 0x624   :  { %vm2484_vm5 = vcmp.gt.f32.partialorder %v2482_v48, 0.0  ;;  %v2486_v51 = vmul.f32 0.01, %v2482_v48 }
 0x625   :  { %v2419_v0 = vpop.f32.mrb[32].mxu0  ;;  %3213 = vmatmul.mubr.msk.f32.gmra.mrb[26].mxu1 %vm292_vm7, %v4040_v3  ;;  %v2504_v10 = vpop.permute.xlu1 %2503 }
 0x626   :  { %v2488_v1 = vsel %vm2484_vm5, %v2482_v48, %v2486_v51  ;;  %v2483_v2 = vmul.f32 %v2480_v12, %v2419_v0  ;;  %v3245_v37 = vpop.f32.mrb[33].mxu0  ;;  %3217 = vmatprep.mubr.msk.f32.mxu1 %vm3572_vm8, %v3570_v39  ;;  %v2563_v51 = vld [vmem:[#allocation3] sm:$0xff]  ;;  %v2547_v12 = vpop.permute.xlu0 %2546 }
 0x627   :  { %v2490_v52 = vmul.f32 0.3, %v2488_v1 }
 0x628   :  { %vm2485_vm9 = vcmp.gt.f32.partialorder %v2483_v2, 0.0  ;;  %v2487_v33 = vmul.f32 0.01, %v2483_v2 }
 0x629   :  { %v2492_v4 = vadd.f32 %v2490_v52, %v2468_v63 }
 0x62a   :  { %v2489_v61 = vsel %vm2485_vm9, %v2483_v2, %v2487_v33 }
 0x62b   :  { %v2491_v6 = vmul.f32 0.3, %v2489_v61 }
 0x62d   :  { %v2493_v41 = vadd.f32 %v2491_v6, %v2469_v62 }
 0x6de   :  { %v2424_v3 = vpop.f32.mrb[34].mxu0 }
 0x6df   :  { %v2506_v55 = vmul.f32 %v2499_v54, %v2424_v3  ;;  %v3248_v7 = vpop.f32.mrb[35].mxu0 }
 0x6e1   :  { %vm2508_vm7 = vcmp.gt.f32.partialorder %v2506_v55, 0.0  ;;  %v2510_v9 = vmul.f32 0.01, %v2506_v55 }
 0x6e2   :  { %v2429_v11 = vpop.f32.mrb[36].mxu0 }
 0x6e3   :  { %v2512_v13 = vsel %vm2508_vm7, %v2506_v55, %v2510_v9  ;;  %v2507_v14 = vmul.f32 %v2504_v10, %v2429_v11  ;;  %v3251_v15 = vpop.f32.mrb[37].mxu0 }
 0x6e4   :  { %v2514_v16 = vmul.f32 0.2, %v2512_v13 }
 0x6e5   :  { %vm2509_vm10 = vcmp.gt.f32.partialorder %v2507_v14, 0.0  ;;  %v2511_v17 = vmul.f32 0.01, %v2507_v14 }
 0x6e6   :  { %v2516_v18 = vadd.f32 %v2514_v16, %v2492_v4  ;;  %v1958_v19 = vpop.f32.mrb[18].mxu1 }
 0x6e7   :  { %v2513_v20 = vsel %vm2509_vm10, %v2507_v14, %v2511_v17  ;;  %2297 = vst.msk [vmem:[#allocation2 + $0x40] sm:$0xff] %vm2288_vm13, %v1958_v19  ;;  %v2434_v21 = vpop.f32.mrb[38].mxu0  ;;  %v3183_v58 = vpop.f32.mrb[19].mxu1 }
 0x6e8   :  { %2518 = vst.msk [vmem:[#allocation6] sm:$0xff] %vm2288_vm13, %v2516_v18  ;;  %v2515_v59 = vmul.f32 0.2, %v2513_v20  ;;  %v2526_v60 = vmul.f32 %v2524_v56, %v2434_v21  ;;  %v3254_v23 = vpop.f32.mrb[39].mxu0 }
 0x6ea   :  { %v2517_v26 = vadd.f32 %v2515_v59, %v2493_v41  ;;  %v2528_v28 = vmul.f32 0.01, %v2526_v60  ;;  %vm2527_vm11 = vcmp.gt.f32.partialorder %v2526_v60, 0.0 }
 0x6eb   :  { %v2439_v30 = vpop.f32.mrb[40].mxu0 }
 0x6ec   :  { %2519 = vst.msk [vmem:[#allocation6 + $0x8] sm:$0xff] %vm2288_vm13, %v2517_v26  ;;  %v2537_v31 = vmul.f32 %v2535_v40, %v2439_v30  ;;  %v3257_v34 = vpop.f32.mrb[41].mxu0  ;;  %v2028_v35 = vpop.f32.mrb[20].mxu1  ;;  %v2529_v45 = vsel %vm2527_vm11, %v2526_v60, %v2528_v28 }
 0x6ed   :  { %v3192_v42 = vpop.f32.mrb[21].mxu1  ;;  %3216 = vmatpush3.msra.mxu1 %v2028_v35  ;;  %v2530_v50 = vmul.f32 0.5, %v2529_v45 }
 0x6ee   :  { %vm2538_vm12 = vcmp.gt.f32.partialorder %v2537_v31, 0.0  ;;  %v2539_v46 = vmul.f32 0.01, %v2537_v31  ;;  %3218 = vmatmul.mubr.msk.f32.vlgmr.msra.gmra.mrb[22].mxu1 %vm208_vm1, %v3947_v22  ;;  %v2306_v47 = vld [vmem:[#allocation2 + $0x40] sm:$0xff]  ;;  %3360 = vmatprep.subr.bf16.mxu1 %v3571_v8 }
 0x6ef   :  { %3259 = vmatmul.mubr.msk.f32.gmra.mrb[42].mxu0 %vm2288_vm13, %v2306_v47  ;;  %3220 = vmatprep.mubr.msk.f32.mxu1 %vm3572_vm8, %v3570_v39 }
 0x6f0   :  { %v2540_v48 = vsel %vm2538_vm12, %v2537_v31, %v2539_v46  ;;  %3362 = vmatpush3.bf16.msra.mxu1 %v3361_v38 }
 0x6f1   :  { %v2541_v36 = vmul.f32 0.3, %v2540_v48  ;;  %3363 = vmatprep.subr.bf16.mxu1 %v3571_v8  ;;  %v2564_v8 = vld [vmem:[#allocation3 + $0x8] sm:$0xff] }
 0x6f2   :  { %3221 = vmatmul.mubr.msk.f32.gmra.mrb[24].mxu1 %vm208_vm1, %v3956_v32  ;;  %v2565_v32 = vld [vmem:[#allocation3 + $0x10] sm:$0xff] }
 0x6f3   :  { %3223 = vmatprep.mubr.msk.f32.mxu1 %vm3572_vm8, %v3570_v39  ;;  %v2542_v22 = vadd.f32 %v2541_v36, %v2530_v50 }
 0x6f4   :  { %3365 = vmatpush3.bf16.msra.mxu1 %v3364_v49 }
 0x6f6   :  { %3224 = vmatmul.mubr.msk.f32.gmra.mrb[26].mxu1 %vm208_vm1, %v3965_v57  ;;  %v2566_v57 = vld [vmem:[#allocation3 + $0x18] sm:$0xff] }
 0x6f7   :  { %3269 = vmatprep.mubr.msk.f32.mxu1 %vm3572_vm8, %v3570_v39 }
 0x6fa   :  { %3270 = vmatmul.mubr.msk.f32.vlgmr.msra.gmra.mrb[28].mxu1 %vm2288_vm13, %v2563_v51 }
 0x6fb   :  { %3272 = vmatprep.mubr.msk.f32.mxu1 %vm3572_vm8, %v3570_v39 }
 0x6fe   :  { %3273 = vmatmul.mubr.msk.f32.gmra.mrb[30].mxu1 %vm2288_vm13, %v2564_v8 }
 0x6ff   :  { %3275 = vmatprep.mubr.msk.f32.mxu1 %vm3572_vm8, %v3570_v39 }
 0x702   :  { %3276 = vmatmul.mubr.msk.f32.gmra.mrb[32].mxu1 %vm2288_vm13, %v2565_v32 }
 0x703   :  { %3278 = vmatprep.mubr.msk.f32.mxu1 %vm3572_vm8, %v3570_v39 }
 0x706   :  { %3279 = vmatmul.mubr.msk.f32.gmra.mrb[34].mxu1 %vm2288_vm13, %v2566_v57 }
 0x707   :  { %3281 = vmatprep.mubr.msk.f32.mxu1 %vm3572_vm8, %v3570_v39 }
 0x7c1   :  { %v2253_v0 = vpop.f32.mrb[22].mxu1 }
 0x7c2   :  { %v2285_v1 = vmul.f32 %v4080_v25, %v2253_v0  ;;  %v3219_v2 = vpop.f32.mrb[23].mxu1  ;;  %v2444_v37 = vpop.f32.mrb[42].mxu0 }
 0x7c3   :  { %v2549_v63 = vmul.f32 %v2547_v12, %v2444_v37  ;;  %v3260_v52 = vpop.f32.mrb[43].mxu0 }
 0x7c4   :  { %2560 = vst.msk [vmem:[#allocation3 + $0x20] sm:$0xff] %vm2288_vm13, %v2285_v1 }
 0x7c5   :  { %vm2550_vm1 = vcmp.gt.f32.partialorder %v2549_v63, 0.0  ;;  %v2551_v53 = vmul.f32 0.01, %v2549_v63  ;;  %v2258_v33 = vpop.f32.mrb[24].mxu1 }
 0x7c6   :  { %v2286_v4 = vmul.f32 %v4086_v27, %v2258_v33  ;;  %v3222_v61 = vpop.f32.mrb[25].mxu1 }
 0x7c7   :  { %v2552_v62 = vsel %vm2550_vm1, %v2549_v63, %v2551_v53 }
 0x7c8   :  { %2561 = vst.msk [vmem:[#allocation3 + $0x28] sm:$0xff] %vm2288_vm13, %v2286_v4  ;;  %v2553_v6 = vmul.f32 0.2, %v2552_v62 }
 0x7c9   :  { %v2263_v41 = vpop.f32.mrb[26].mxu1 }
 0x7ca   :  { %v2287_v56 = vmul.f32 %v4095_v29, %v2263_v41  ;;  %v3225_v25 = vpop.f32.mrb[27].mxu1  ;;  %v2554_v40 = vadd.f32 %v2553_v6, %v2542_v22 }
 0x7cb   :  { %v2567_v54 = vld [vmem:[#allocation3 + $0x20] sm:$0xff] }
 0x7cc   :  { %2562 = vst.msk [vmem:[#allocation3 + $0x30] sm:$0xff] %vm2288_vm13, %v2287_v56  ;;  %3282 = vmatmul.mubr.msk.f32.gmra.mrb[36].mxu1 %vm2288_vm13, %v2567_v54  ;;  %2555 = vst.msk [vmem:[#allocation4] sm:$0xff] %vm2288_vm13, %v2554_v40 }
 0x7cd   :  { %v2661_v3 = vpop.f32.mrb[28].mxu1  ;;  %3284 = vmatprep.mubr.msk.f32.mxu1 %vm3572_vm8, %v3570_v39 }
 0x7ce   :  { %vm2695_vm14 = vcmp.gt.f32.partialorder %v2661_v3, 0.0  ;;  %v2702_v27 = vmul.f32 0.01, %v2661_v3  ;;  %v3271_v55 = vpop.f32.mrb[29].mxu1 }
 0x7cf   :  { %v2568_v7 = vld [vmem:[#allocation3 + $0x28] sm:$0xff] }
 0x7d0   :  { %v2709_v9 = vsel %vm2695_vm14, %v2661_v3, %v2702_v27  ;;  %3285 = vmatmul.mubr.msk.f32.gmra.mrb[38].mxu1 %vm2288_vm13, %v2568_v7 }
 0x7d1   :  { %2716 = vst.msk [vmem:[#allocation8] sm:$0xff] %vm2288_vm13, %v2709_v9  ;;  %v2666_v29 = vpop.f32.mrb[30].mxu1  ;;  %3287 = vmatprep.mubr.msk.f32.mxu1 %vm3572_vm8, %v3570_v39 }
 0x7d2   :  { %vm2696_vm15 = vcmp.gt.f32.partialorder %v2666_v29, 0.0  ;;  %v2703_v10 = vmul.f32 0.01, %v2666_v29  ;;  %v3274_v11 = vpop.f32.mrb[31].mxu1 }
 0x7d3   :  { %v2569_v13 = vld [vmem:[#allocation3 + $0x30] sm:$0xff] }
 0x7d4   :  { %v2710_v14 = vsel %vm2696_vm15, %v2666_v29, %v2703_v10  ;;  %3288 = vmatmul.mubr.msk.f32.gmra.mrb[40].mxu1 %vm2288_vm13, %v2569_v13 }
 0x7d5   :  { %2717 = vst.msk [vmem:[#allocation8 + $0x8] sm:$0xff] %vm2288_vm13, %v2710_v14  ;;  %v2671_v15 = vpop.f32.mrb[32].mxu1 }
 0x7d6   :  { %vm2697_vm0 = vcmp.gt.f32.partialorder %v2671_v15, 0.0  ;;  %v2704_v16 = vmul.f32 0.01, %v2671_v15  ;;  %v3277_v17 = vpop.f32.mrb[33].mxu1 }
 0x7d8   :  { %v2711_v18 = vsel %vm2697_vm0, %v2671_v15, %v2704_v16 }
 0x7d9   :  { %2718 = vst.msk [vmem:[#allocation9] sm:$0xff] %vm2288_vm13, %v2711_v18  ;;  %v2676_v19 = vpop.f32.mrb[34].mxu1 }
 0x7da   :  { %vm2698_vm2 = vcmp.gt.f32.partialorder %v2676_v19, 0.0  ;;  %v2705_v20 = vmul.f32 0.01, %v2676_v19  ;;  %v3280_v39 = vpop.f32.mrb[35].mxu1 }
 0x7dc   :  { %v2712_v21 = vsel %vm2698_vm2, %v2676_v19, %v2705_v20 }
 0x7dd   :  { %2719 = vst.msk [vmem:[#allocation9 + $0x8] sm:$0xff] %vm2288_vm13, %v2712_v21 }
 0x7de   :  { %3432 = shalt.err (!%p3429_p4)
}
 0x7df   :  { %s3433_s7 = scalar_lea.hbm %s3731_s6, 256 }
 0x7e0   :  { %p3434_p5 = scmp.ne.s32.totalorder %s3731_s6, %s3433_s7  ;;  %p3437_p6 = scmp.lt.u32.totalorder %s3433_s7, %s3731_s6 }
 0x7e2   :  { %p3439_p7 = pnand %p3437_p6, %p3434_p5 }
 0x7e4   :  { %3442 = shalt.err (!%p3439_p7)
}
 0x7e5   :  { %s3575_s11 = smov 128   ;;  %s3576_s16 = smov 8  }
 0x7e6   :  { %2744 = dma.vmem_to_hbm [thread:$0]  %s2739_s1, 256, %s3731_s6, [#allocation7], %s3575_s11, %s3575_s11, %s3576_s16  }
 0x7e7   :  { %s3443_s15 = scalar_lea.vmem %s4168_s2, 256  ;;  %p3448_p9 = scmp.lt.s32.totalorder %s4168_s2, %s4168_s2 }
 0x7e8   :  { %p3444_p8 = scmp.ne.s32.totalorder %s4168_s2, %s3443_s15  ;;  %p3449_p10 = scmp.lt.s32.totalorder %s3443_s15, %s3443_s15 }
 0x7ea   :  { %p3450_p11 = por %p3449_p10, %p3448_p9 }
 0x7ec   :  { %p3451_p12 = pnand %p3450_p11, %p3444_p8 }
 0x7ee   :  { %3454 = shalt.err (!%p3451_p12)
}
 0x7ef   :  { %s3455_s18 = scalar_lea.hbm %s3741_s12, 256 }
 0x7f0   :  { %p3456_p13 = scmp.ne.s32.totalorder %s3741_s12, %s3455_s18  ;;  %p3459_p0 = scmp.lt.u32.totalorder %s3455_s18, %s3741_s12 }
 0x7f2   :  { %p3461_p1 = pnand %p3459_p0, %p3456_p13 }
 0x7f4   :  { %3464 = shalt.err (!%p3461_p1)
}
 0x7f5   :  { %2768 = dma.vmem_to_hbm [thread:$0]  %s4168_s2, 256, %s3741_s12, [#allocation10], %s3575_s11, %s3575_s11, %s3576_s16  }
 0x7f6   :  { %s3577_s6 = smov [#allocation4]   ;;  %s3578_s22 = smov [#allocation8]  }
 0x7f7   :  { %s2729_s23 = sshll.u32 %s3577_s6, 4  ;;  %s2750_s26 = sshll.u32 %s3578_s22, 4  ;;  %s2730_s23 = int_to_ptr.vmem [resolvable:$true] %s2729_s23  ;;  %s4189_s26 = int_to_ptr.vmem [resolvable:$true] %s2750_s26 }
 0x7f8   :  { %s3465_s0 = scalar_lea.vmem %s2730_s23, 128  ;;  %p3470_p3 = scmp.lt.s32.totalorder %s2730_s23, %s2730_s23 }
 0x7f9   :  { %p3466_p2 = scmp.ne.s32.totalorder %s2730_s23, %s3465_s0  ;;  %p3471_p4 = scmp.lt.s32.totalorder %s3465_s0, %s3465_s0 }
 0x7fb   :  { %p3472_p5 = por %p3471_p4, %p3470_p3 }
 0x7fd   :  { %p3473_p6 = pnand %p3472_p5, %p3466_p2 }
 0x7ff   :  { %3476 = shalt.err (!%p3473_p6)
}
 0x800   :  { %s4255_s9 = sld [smem:[#allocation29_spill]] }
 0x806   :  { %s3477_s5 = scalar_lea.hbm %s4255_s9, 128 }
 0x807   :  { %p3478_p7 = scmp.ne.s32.totalorder %s4255_s9, %s3477_s5  ;;  %p3481_p8 = scmp.lt.u32.totalorder %s3477_s5, %s4255_s9 }
 0x809   :  { %p3483_p9 = pnand %p3481_p8, %p3478_p7 }
 0x80b   :  { %3486 = shalt.err (!%p3483_p9)
}
 0x80c   :  { %2732 = dma.vmem_to_hbm [thread:$0]  %s2730_s23, 128, %s4255_s9, [#allocation5]  }
 0x80d   :  { %s3487_s12 = scalar_lea.vmem %s4189_s26, 256  ;;  %p3492_p11 = scmp.lt.s32.totalorder %s4189_s26, %s4189_s26 }
 0x80e   :  { %p3488_p10 = scmp.ne.s32.totalorder %s4189_s26, %s3487_s12  ;;  %p3493_p12 = scmp.lt.s32.totalorder %s3487_s12, %s3487_s12 }
 0x810   :  { %p3494_p13 = por %p3493_p12, %p3492_p11 }
 0x812   :  { %p3495_p0 = pnand %p3494_p13, %p3488_p10 }
 0x814   :  { %3498 = shalt.err (!%p3495_p0)
}
 0x815   :  { %s3499_s17 = scalar_lea.hbm %s3736_s30, 256 }
 0x816   :  { %p3500_p1 = scmp.ne.s32.totalorder %s3736_s30, %s3499_s17  ;;  %p3503_p2 = scmp.lt.u32.totalorder %s3499_s17, %s3736_s30 }
 0x818   :  { %p3505_p3 = pnand %p3503_p2, %p3500_p1 }
 0x81a   :  { %3508 = shalt.err (!%p3505_p3)
}
 0x81b   :  { %2756 = dma.vmem_to_hbm [thread:$0]  %s4189_s26, 256, %s3736_s30, [#allocation7], %s3575_s11, %s3575_s11, %s3576_s16  }
 0x81c   :  { %s3579_s21 = smov [#allocation11]  }
 0x81d   :  { %s2774_s25 = sshll.u32 %s3579_s21, 4  ;;  %s2775_s25 = int_to_ptr.vmem [resolvable:$true] %s2774_s25 }
 0x81e   :  { %s3509_s30 = scalar_lea.vmem %s2775_s25, 384  ;;  %p3514_p5 = scmp.lt.s32.totalorder %s2775_s25, %s2775_s25 }
 0x81f   :  { %p3510_p4 = scmp.ne.s32.totalorder %s2775_s25, %s3509_s30  ;;  %p3515_p6 = scmp.lt.s32.totalorder %s3509_s30, %s3509_s30 }
 0x821   :  { %p3516_p7 = por %p3515_p6, %p3514_p5 }
 0x823   :  { %p3517_p8 = pnand %p3516_p7, %p3510_p4 }
 0x89f   :  { %v2681_v58 = vpop.f32.mrb[36].mxu1 }
 0x8a0   :  { %vm2699_vm8 = vcmp.gt.f32.partialorder %v2681_v58, 0.0  ;;  %v2706_v59 = vmul.f32 0.01, %v2681_v58  ;;  %v3283_v60 = vpop.f32.mrb[37].mxu1 }
 0x8a2   :  { %v2713_v23 = vsel %vm2699_vm8, %v2681_v58, %v2706_v59 }
 0x8a3   :  { %2720 = vst.msk [vmem:[#allocation11] sm:$0xff] %vm2288_vm13, %v2713_v23  ;;  %v2686_v24 = vpop.f32.mrb[38].mxu1 }
 0x8a4   :  { %vm2700_vm3 = vcmp.gt.f32.partialorder %v2686_v24, 0.0  ;;  %v2707_v5 = vmul.f32 0.01, %v2686_v24  ;;  %v3286_v26 = vpop.f32.mrb[39].mxu1 }
 0x8a6   :  { %v2714_v28 = vsel %vm2700_vm3, %v2686_v24, %v2707_v5 }
 0x8a7   :  { %2721 = vst.msk [vmem:[#allocation11 + $0x8] sm:$0xff] %vm2288_vm13, %v2714_v28  ;;  %v2691_v30 = vpop.f32.mrb[40].mxu1 }
 0x8a8   :  { %vm2701_vm4 = vcmp.gt.f32.partialorder %v2691_v30, 0.0  ;;  %v2708_v31 = vmul.f32 0.01, %v2691_v30  ;;  %v3289_v34 = vpop.f32.mrb[41].mxu1 }
 0x8aa   :  { %v2715_v35 = vsel %vm2701_vm4, %v2691_v30, %v2708_v31 }
 0x8ab   :  { %2722 = vst.msk [vmem:[#allocation11 + $0x10] sm:$0xff] %vm2288_vm13, %v2715_v35 }
 0x8ac   :  { %3520 = shalt.err (!%p3517_p8)
}
 0x8ad   :  { %s3521_s29 = scalar_lea.hbm %s3746_s13, 384 }
 0x8ae   :  { %p3522_p9 = scmp.ne.s32.totalorder %s3746_s13, %s3521_s29  ;;  %p3525_p10 = scmp.lt.u32.totalorder %s3521_s29, %s3746_s13 }
 0x8b0   :  { %p3527_p11 = pnand %p3525_p10, %p3522_p9 }
 0x8b2   :  { %3530 = shalt.err (!%p3527_p11)
}
 0x8b3   :  { %2780 = dma.vmem_to_hbm [thread:$0]  %s2775_s25, 384, %s3746_s13, [#allocation10], %s3575_s11, %s3575_s11, %s3576_s16  }
 0x8b4   :  { %3531 = dma.done.wait [#allocation5], 128  }
 0x8b5   :  { %3532 = vsyncadd [#allocation5], 4294967168 }
 0x8b6   :  { %3533 = dma.done.wait [#allocation7], 512  }
 0x8b7   :  { %3534 = vsyncadd [#allocation7], 4294966784 }
 0x8b8   :  { %3535 = dma.done.wait [#allocation10], 640  }
 0x8b9   :  { %3536 = vsyncadd [#allocation10], 4294966656 }
 0x8ba   :  { %2796 = vsyncpa [#allocation5], 1 }
 0x8bb   :  { %2797 = vsyncpa [#allocation7], 1 }
 0x8bc   :  { %2798 = vsyncpa [#allocation10], 1 }

</bundles_post_ra>
